<compile_context>
chip_gen: v7x
topology: tpu7x:2x2x1
jax: 0.10.0
libtpu: 0.0.40
codegen_flags: <defaults>
</compile_context>

<pallas_src>
import functools
import math

import jax
import jax.numpy as jnp
from jax import lax
from jax.experimental import pallas as pl
from jax.experimental.pallas import tpu as pltpu

LATENT_DIM = 100
HIDDEN1 = 128
HIDDEN2 = 256
IMG_SHAPE = 28 * 28          # 784
BN_EPS = 1e-5
_VMEM_LIMIT = 32 * 1024 * 1024


def _round_up(x, m):
    return (x + m - 1) // m * m


# ---------------- fused kernel ------------------------------------------------

def _generator_kernel(z_ref, w1_ref, b1_ref, w2_ref, b2_ref,
                      gamma_ref, beta_ref, w3_ref, b3_ref,
                      out_ref,
                      h2_ref, sum_ref, sumsq_ref, scale_ref, shift_ref,
                      *, tile_b, valid_b, n_pad):
    p = pl.program_id(0)       # phase: 0 = fc1/ReLU/fc2 + stats, 1 = BN/ReLU/fc3/tanh
    i = pl.program_id(1)       # batch tile
    row0 = pl.multiple_of(i * tile_b, 8)

    @pl.when(p == 0)
    def _phase0():
        @pl.when(i == 0)
        def _init():
            sum_ref[...] = jnp.zeros_like(sum_ref)
            sumsq_ref[...] = jnp.zeros_like(sumsq_ref)

        h1 = jnp.dot(z_ref[...].astype(w1_ref.dtype), w1_ref[...],
                     preferred_element_type=jnp.float32) + b1_ref[...]
        h1 = jnp.maximum(h1, 0.0)
        h2 = jnp.dot(h1.astype(w2_ref.dtype), w2_ref[...],
                     preferred_element_type=jnp.float32) + b2_ref[...]
        h2_ref[pl.ds(row0, tile_b), :] = h2
        sum_ref[...] += jnp.sum(h2, axis=0, keepdims=True)
        sumsq_ref[...] += jnp.sum(h2 * h2, axis=0, keepdims=True)

    @pl.when(p == 1)
    def _phase1():
        @pl.when(i == 0)
        def _finalize():
            s = sum_ref[...]
            ss = sumsq_ref[...]
            if n_pad:
                # Zero-padded batch rows all produce the identical fc2 row
                # h2_pad = relu(b1) @ w2 + b2 ; remove their contribution.
                h1p = jnp.maximum(b1_ref[...], 0.0)
                h2p = jnp.dot(h1p.astype(w2_ref.dtype), w2_ref[...],
                              preferred_element_type=jnp.float32) + b2_ref[...]
                s = s - n_pad * h2p
                ss = ss - n_pad * (h2p * h2p)
            mean = s * (1.0 / valid_b)
            # NOTE: E[x^2]-E[x]^2 in f32; clamp guards negative variance but
            # not cancellation if pre-BN activations drift to a huge mean.
            var = jnp.maximum(ss * (1.0 / valid_b) - mean * mean, 0.0)
            inv = lax.rsqrt(var + BN_EPS)
            scale = gamma_ref[...] * inv
            scale_ref[...] = scale
            shift_ref[...] = beta_ref[...] - mean * scale

        x = h2_ref[pl.ds(row0, tile_b), :] * scale_ref[...] + shift_ref[...]
        x = jnp.maximum(x, 0.0)
        y = jnp.dot(x.astype(w3_ref.dtype), w3_ref[...],
                    preferred_element_type=jnp.float32) + b3_ref[...]
        out_ref[...] = jnp.tanh(y).astype(out_ref.dtype)


# ---------------- wrapper -----------------------------------------------------

def generator_forward(z, params, *, block_b=512, out_dtype=jnp.float32):
    """z: (B, 100) float32. Returns (B, 784) in `out_dtype`."""
    B = z.shape[0]
    assert z.shape[1] == LATENT_DIM
    tile_b = max(8, min(_round_up(block_b, 8), _round_up(B, 8)))
    Bp = _round_up(B, tile_b)
    n_tiles = Bp // tile_b
    n_pad = Bp - B

    z_p = z.astype(jnp.float32)
    if n_pad:
        z_p = jnp.pad(z_p, ((0, n_pad), (0, 0)))

    w1, b1 = params["w1"], params["b1"]
    w2, b2 = params["w2"], params["b2"]
    w3, b3 = params["w3"], params["b3"]
    gamma, beta = params["gamma"], params["beta"]

    out_itemsize = jnp.dtype(out_dtype).itemsize
    wbytes = sum(int(params[k].size) * params[k].dtype.itemsize
                 for k in ("w1", "b1", "w2", "b2", "gamma", "beta", "w3", "b3"))
    # VMEM budget (x2 headroom for double-buffered blocks / layout padding).
    vmem_est = (2 * wbytes + Bp * HIDDEN2 * 4
                + 2 * tile_b * LATENT_DIM * 4
                + 2 * tile_b * IMG_SHAPE * out_itemsize
                + 4 * HIDDEN2 * 4)
    if vmem_est > int(0.75 * _VMEM_LIMIT):
        # TODO(synk): for very large batches spill h2 to HBM (two-pass
        # pipelined version); the fused kernel keeps it resident in VMEM.
        raise ValueError(f"batch {B} too large for fused kernel "
                         f"(VMEM estimate {vmem_est} bytes)")

    cost = pl.CostEstimate(
        flops=int(2 * Bp * (LATENT_DIM * HIDDEN1 + HIDDEN1 * HIDDEN2
                            + HIDDEN2 * IMG_SHAPE)),
        transcendentals=int(Bp * IMG_SHAPE + HIDDEN2),
        bytes_accessed=int(Bp * LATENT_DIM * 4 + wbytes
                           + Bp * IMG_SHAPE * out_itemsize),
    )

    kernel = functools.partial(_generator_kernel, tile_b=tile_b, valid_b=B,
                               n_pad=n_pad)
    const = lambda p, i: (0, 0)   # weights resident: DMA'd once per call

    out = pl.pallas_call(
        kernel,
        out_shape=jax.ShapeDtypeStruct((Bp, IMG_SHAPE), out_dtype),
        grid=(2, n_tiles),
        in_specs=[
            pl.BlockSpec((tile_b, LATENT_DIM), lambda p, i: ((1 - p) * i, 0)),
            pl.BlockSpec((LATENT_DIM, HIDDEN1), const),
            pl.BlockSpec((1, HIDDEN1), const),
            pl.BlockSpec((HIDDEN1, HIDDEN2), const),
            pl.BlockSpec((1, HIDDEN2), const),
            pl.BlockSpec((1, HIDDEN2), const),
            pl.BlockSpec((1, HIDDEN2), const),
            pl.BlockSpec((HIDDEN2, IMG_SHAPE), const),
            pl.BlockSpec((1, IMG_SHAPE), const),
        ],
        # Block index pinned to 0 during phase 0 -> no garbage writebacks;
        # each output tile is written exactly once, in phase 1.
        out_specs=pl.BlockSpec((tile_b, IMG_SHAPE), lambda p, i: (p * i, 0)),
        scratch_shapes=[
            pltpu.VMEM((Bp, HIDDEN2), jnp.float32),   # h2 (persists across phases)
            pltpu.VMEM((1, HIDDEN2), jnp.float32),    # sum
            pltpu.VMEM((1, HIDDEN2), jnp.float32),    # sumsq
            pltpu.VMEM((1, HIDDEN2), jnp.float32),    # BN scale
            pltpu.VMEM((1, HIDDEN2), jnp.float32),    # BN shift
        ],
        compiler_params=pltpu.CompilerParams(
            # Both axes sequential: phase 1 consumes the resident h2/stats
            # scratch written in phase 0.  (A v7x megacore split would need
            # per-core partial stats + a cross-core reduce; not worth it at
            # this size since the whole problem already lives in one TC's VMEM.)
            dimension_semantics=("arbitrary", "arbitrary"),
            vmem_limit_bytes=_VMEM_LIMIT),
        cost_estimate=cost,
    )(z_p, w1, b1, w2, b2, gamma, beta, w3, b3)

    return out if n_pad == 0 else out[:B]


# ---------------- params / reference ------------------------------------------

def init_params(key):
    """PyTorch-default Linear init (U[-1/sqrt(fan_in), +1/sqrt(fan_in)]),
    weights stored pre-transposed as (in, out), exact (unpadded) dims."""
    ks = jax.random.split(key, 6)

    def linear(kw, kb, fan_in, fan_out):
        bound = 1.0 / math.sqrt(fan_in)
        w = jax.random.uniform(kw, (fan_in, fan_out), jnp.float32, -bound, bound)
        b = jax.random.uniform(kb, (1, fan_out), jnp.float32, -bound, bound)
        return w, b

    w1, b1 = linear(ks[0], ks[1], LATENT_DIM, HIDDEN1)
    w2, b2 = linear(ks[2], ks[3], HIDDEN1, HIDDEN2)
    w3, b3 = linear(ks[4], ks[5], HIDDEN2, IMG_SHAPE)
    return {"w1": w1, "b1": b1, "w2": w2, "b2": b2,
            "gamma": jnp.ones((1, HIDDEN2), jnp.float32),
            "beta": jnp.zeros((1, HIDDEN2), jnp.float32),
            "w3": w3, "b3": b3}


def with_matmul_dtype(params, dtype):
    """Pre-cast matmul weights once (e.g. bf16 for MXU throughput)."""
    p = dict(params)
    for k in ("w1", "w2", "w3"):
        p[k] = params[k].astype(dtype)
    return p


def _reference_forward(z, p):
    """Pure-JAX f32 reference (training-mode BatchNorm1d)."""
    x = jnp.maximum(z @ p["w1"].astype(jnp.float32) + p["b1"], 0.0)
    x = x @ p["w2"].astype(jnp.float32) + p["b2"]
    mean = jnp.mean(x, axis=0, keepdims=True)
    var = jnp.mean((x - mean) ** 2, axis=0, keepdims=True)
    x = (x - mean) / jnp.sqrt(var + BN_EPS) * p["gamma"] + p["beta"]
    x = jnp.maximum(x, 0.0)
    return jnp.tanh(x @ p["w3"].astype(jnp.float32) + p["b3"])
# TODO(synk): BatchNorm1d running_mean/running_var buffer updates (training-side
# state, not part of the forward output) are not modeled.


if __name__ == "__main__":
    key = jax.random.PRNGKey(0)
    k_params, k_z1, k_z2 = jax.random.split(key, 3)
    params = init_params(k_params)

    # Small batch: single 64-row tile, no padding, no output slice.
    z = jax.random.normal(k_z1, (64, LATENT_DIM), jnp.float32)
    fwd = jax.jit(generator_forward)
    out = jax.block_until_ready(fwd(z, params))
    ref = _reference_forward(z, params)
    assert out.shape == (64, IMG_SHAPE)
    assert jnp.allclose(out, ref, atol=1e-4, rtol=1e-4), (
        "f32 mismatch: max|d|=%e" % float(jnp.max(jnp.abs(out - ref))))

    # Ragged multi-tile batch (200 rows, 128-row tiles -> 56 padded rows):
    # exercises the in-kernel padded-row stats correction and batch crop.
    z2 = jax.random.normal(k_z2, (200, LATENT_DIM), jnp.float32)
    fwd2 = jax.jit(functools.partial(generator_forward, block_b=128))
    out2 = jax.block_until_ready(fwd2(z2, params))
    ref2 = _reference_forward(z2, params)
    assert out2.shape == (200, IMG_SHAPE)
    assert jnp.allclose(out2, ref2, atol=1e-4, rtol=1e-4), (
        "ragged f32 mismatch: max|d|=%e" % float(jnp.max(jnp.abs(out2 - ref2))))

    # bf16 matmul weights (MXU throughput path); bias/BN/tanh remain f32.
    params_bf16 = with_matmul_dtype(params, jnp.bfloat16)
    out_bf = jax.block_until_ready(fwd(z, params_bf16))
    assert jnp.allclose(out_bf, ref, atol=1e-1), (
        "bf16-weight mismatch: max|d|=%e" % float(jnp.max(jnp.abs(out_bf - ref))))

    # Optional bf16 output (halves the output HBM stream).
    fwd_lp = jax.jit(functools.partial(generator_forward, out_dtype=jnp.bfloat16))
    out_lp = jax.block_until_ready(fwd_lp(z, params))
    assert out_lp.dtype == jnp.bfloat16
    assert jnp.allclose(out_lp.astype(jnp.float32), ref, atol=2e-2), (
        "bf16-out mismatch: max|d|=%e"
        % float(jnp.max(jnp.abs(out_lp.astype(jnp.float32) - ref))))

    print("KERNEL_OK")
</pallas_src>

<mosaic_0001>
module attributes {stable_mosaic.version = 11 : i64} {
  func.func @_generator_kernel(%arg0: i32, %arg1: i32, %arg2: memref<64x100xf32, #tpu.memory_space<vmem>>, %arg3: memref<100x128xf32, #tpu.memory_space<vmem>>, %arg4: memref<1x128xf32, #tpu.memory_space<vmem>>, %arg5: memref<128x256xf32, #tpu.memory_space<vmem>>, %arg6: memref<1x256xf32, #tpu.memory_space<vmem>>, %arg7: memref<1x256xf32, #tpu.memory_space<vmem>>, %arg8: memref<1x256xf32, #tpu.memory_space<vmem>>, %arg9: memref<256x784xf32, #tpu.memory_space<vmem>>, %arg10: memref<1x784xf32, #tpu.memory_space<vmem>>, %arg11: memref<64x784xf32, #tpu.memory_space<vmem>>, %arg12: memref<64x256xf32, #tpu.memory_space<vmem>>, %arg13: memref<1x256xf32, #tpu.memory_space<vmem>>, %arg14: memref<1x256xf32, #tpu.memory_space<vmem>>, %arg15: memref<1x256xf32, #tpu.memory_space<vmem>>, %arg16: memref<1x256xf32, #tpu.memory_space<vmem>>) attributes {dimension_semantics = [#tpu.dimension_semantics<arbitrary>, #tpu.dimension_semantics<arbitrary>], iteration_bounds = array<i64: 2, 1>, scalar_prefetch = 0 : i64, scratch_operands = 5 : i64, tpu.core_type = #tpu.core_type<tc>, window_params = [{transform_indices = @transform_0, window_bounds = array<i64: 64, 100>}, {pipeline_mode = #tpu.pipeline_mode<synchronous>, transform_indices = @transform_1, window_bounds = array<i64: 100, 128>}, {pipeline_mode = #tpu.pipeline_mode<synchronous>, transform_indices = @transform_2, window_bounds = array<i64: 1, 128>}, {pipeline_mode = #tpu.pipeline_mode<synchronous>, transform_indices = @transform_3, window_bounds = array<i64: 128, 256>}, {pipeline_mode = #tpu.pipeline_mode<synchronous>, transform_indices = @transform_4, window_bounds = array<i64: 1, 256>}, {pipeline_mode = #tpu.pipeline_mode<synchronous>, transform_indices = @transform_5, window_bounds = array<i64: 1, 256>}, {pipeline_mode = #tpu.pipeline_mode<synchronous>, transform_indices = @transform_6, window_bounds = array<i64: 1, 256>}, {pipeline_mode = #tpu.pipeline_mode<synchronous>, transform_indices = @transform_7, window_bounds = array<i64: 256, 784>}, {pipeline_mode = #tpu.pipeline_mode<synchronous>, transform_indices = @transform_8, window_bounds = array<i64: 1, 784>}, {transform_indices = @transform_9, window_bounds = array<i64: 64, 784>}]} {
    %c64_i32 = arith.constant 64 : i32
    %0 = arith.muli %arg1, %c64_i32 : i32
    %1 = tpu.assume_multiple %0, 8 : i32
    %c0_i32 = arith.constant 0 : i32
    %2 = arith.cmpi eq, %arg0, %c0_i32 : i32
    %3 = arith.extui %2 : i1 to i32
    %c0_i32_0 = arith.constant 0 : i32
    %4 = arith.cmpi ne, %3, %c0_i32_0 : i32
    scf.if %4 {
      %c0_i32_2 = arith.constant 0 : i32
      %8 = arith.cmpi eq, %arg1, %c0_i32_2 : i32
      %9 = arith.extui %8 : i1 to i32
      %c0_i32_3 = arith.constant 0 : i32
      %10 = arith.cmpi ne, %9, %c0_i32_3 : i32
      scf.if %10 {
        %cst_26 = arith.constant 0.000000e+00 : f32
        %37 = vector.broadcast %cst_26 : f32 to vector<1x256xf32>
        %c0_27 = arith.constant 0 : index
        %c0_28 = arith.constant 0 : index
        %38 = vector.load %arg13[%c0_27, %c0_28] : memref<1x256xf32, #tpu.memory_space<vmem>>, vector<1x256xf32>
        tpu.vector_store %arg13[%c0_27, %c0_28], %37 {strides = array<i32>} : memref<1x256xf32, #tpu.memory_space<vmem>>, vector<1x256xf32>,
        %cst_29 = arith.constant 0.000000e+00 : f32
        %39 = vector.broadcast %cst_29 : f32 to vector<1x256xf32>
        %c0_30 = arith.constant 0 : index
        %c0_31 = arith.constant 0 : index
        %40 = vector.load %arg14[%c0_30, %c0_31] : memref<1x256xf32, #tpu.memory_space<vmem>>, vector<1x256xf32>
        tpu.vector_store %arg14[%c0_30, %c0_31], %39 {strides = array<i32>} : memref<1x256xf32, #tpu.memory_space<vmem>>, vector<1x256xf32>,
      } else {
      }
      %c0 = arith.constant 0 : index
      %c0_4 = arith.constant 0 : index
      %11 = vector.load %arg2[%c0, %c0_4] : memref<64x100xf32, #tpu.memory_space<vmem>>, vector<64x100xf32>
      %c0_5 = arith.constant 0 : index
      %c0_6 = arith.constant 0 : index
      %12 = vector.load %arg3[%c0_5, %c0_6] : memref<100x128xf32, #tpu.memory_space<vmem>>, vector<100x128xf32>
      %cst = arith.constant dense<0.000000e+00> : vector<64x128xf32>
      %13 = tpu.matmul %11, %12, %cst {dimension_numbers = #tpu.dot_dimension_numbers<[1], [0], [0], [1], [0, 0, 1, 1], [], []>} : vector<64x100xf32>, vector<100x128xf32>, vector<64x128xf32> -> vector<64x128xf32>
      %c0_7 = arith.constant 0 : index
      %c0_8 = arith.constant 0 : index
      %14 = vector.load %arg4[%c0_7, %c0_8] : memref<1x128xf32, #tpu.memory_space<vmem>>, vector<1x128xf32>
      %15 = vector.broadcast %14 : vector<1x128xf32> to vector<64x128xf32>
      %16 = arith.addf %13, %15 : vector<64x128xf32>
      %cst_9 = arith.constant 0.000000e+00 : f32
      %17 = vector.broadcast %cst_9 : f32 to vector<64x128xf32>
      %18 = arith.maximumf %16, %17 : vector<64x128xf32>
      %c0_10 = arith.constant 0 : index
      %c0_11 = arith.constant 0 : index
      %19 = vector.load %arg5[%c0_10, %c0_11] : memref<128x256xf32, #tpu.memory_space<vmem>>, vector<128x256xf32>
      %cst_12 = arith.constant dense<0.000000e+00> : vector<64x256xf32>
      %20 = tpu.matmul %18, %19, %cst_12 {dimension_numbers = #tpu.dot_dimension_numbers<[1], [0], [0], [1], [0, 0, 1, 1], [], []>} : vector<64x128xf32>, vector<128x256xf32>, vector<64x256xf32> -> vector<64x256xf32>
      %c0_13 = arith.constant 0 : index
      %c0_14 = arith.constant 0 : index
      %21 = vector.load %arg6[%c0_13, %c0_14] : memref<1x256xf32, #tpu.memory_space<vmem>>, vector<1x256xf32>
      %22 = vector.broadcast %21 : vector<1x256xf32> to vector<64x256xf32>
      %23 = arith.addf %20, %22 : vector<64x256xf32>
      %24 = arith.index_cast %1 : i32 to index
      %c0_15 = arith.constant 0 : index
      %25 = vector.load %arg12[%24, %c0_15] : memref<64x256xf32, #tpu.memory_space<vmem>>, vector<64x256xf32>
      tpu.vector_store %arg12[%24, %c0_15], %23 {strides = array<i32>} : memref<64x256xf32, #tpu.memory_space<vmem>>, vector<64x256xf32>,
      %c0_16 = arith.constant 0 : index
      %c0_17 = arith.constant 0 : index
      %26 = vector.load %arg13[%c0_16, %c0_17] : memref<1x256xf32, #tpu.memory_space<vmem>>, vector<1x256xf32>
      %cst_18 = arith.constant dense<0.000000e+00> : vector<256xf32>
      %27 = vector.multi_reduction <add>, %23, %cst_18 [0] : vector<64x256xf32> to vector<256xf32>
      %28 = vector.shape_cast %27 : vector<256xf32> to vector<1x256xf32>
      %29 = arith.addf %26, %28 : vector<1x256xf32>
      %c0_19 = arith.constant 0 : index
      %c0_20 = arith.constant 0 : index
      %30 = vector.load %arg13[%c0_19, %c0_20] : memref<1x256xf32, #tpu.memory_space<vmem>>, vector<1x256xf32>
      tpu.vector_store %arg13[%c0_19, %c0_20], %29 {strides = array<i32>} : memref<1x256xf32, #tpu.memory_space<vmem>>, vector<1x256xf32>,
      %c0_21 = arith.constant 0 : index
      %c0_22 = arith.constant 0 : index
      %31 = vector.load %arg14[%c0_21, %c0_22] : memref<1x256xf32, #tpu.memory_space<vmem>>, vector<1x256xf32>
      %32 = arith.mulf %23, %23 : vector<64x256xf32>
      %cst_23 = arith.constant dense<0.000000e+00> : vector<256xf32>
      %33 = vector.multi_reduction <add>, %32, %cst_23 [0] : vector<64x256xf32> to vector<256xf32>
      %34 = vector.shape_cast %33 : vector<256xf32> to vector<1x256xf32>
      %35 = arith.addf %31, %34 : vector<1x256xf32>
      %c0_24 = arith.constant 0 : index
      %c0_25 = arith.constant 0 : index
      %36 = vector.load %arg14[%c0_24, %c0_25] : memref<1x256xf32, #tpu.memory_space<vmem>>, vector<1x256xf32>
      tpu.vector_store %arg14[%c0_24, %c0_25], %35 {strides = array<i32>} : memref<1x256xf32, #tpu.memory_space<vmem>>, vector<1x256xf32>,
    } else {
    }
    %c1_i32 = arith.constant 1 : i32
    %5 = arith.cmpi eq, %arg0, %c1_i32 : i32
    %6 = arith.extui %5 : i1 to i32
    %c0_i32_1 = arith.constant 0 : i32
    %7 = arith.cmpi ne, %6, %c0_i32_1 : i32
    scf.if %7 {
      %c0_i32_2 = arith.constant 0 : i32
      %8 = arith.cmpi eq, %arg1, %c0_i32_2 : i32
      %9 = arith.extui %8 : i1 to i32
      %c0_i32_3 = arith.constant 0 : i32
      %10 = arith.cmpi ne, %9, %c0_i32_3 : i32
      scf.if %10 {
        %c0_15 = arith.constant 0 : index
        %c0_16 = arith.constant 0 : index
        %28 = vector.load %arg13[%c0_15, %c0_16] : memref<1x256xf32, #tpu.memory_space<vmem>>, vector<1x256xf32>
        %c0_17 = arith.constant 0 : index
        %c0_18 = arith.constant 0 : index
        %29 = vector.load %arg14[%c0_17, %c0_18] : memref<1x256xf32, #tpu.memory_space<vmem>>, vector<1x256xf32>
        %cst_19 = arith.constant 1.562500e-02 : f32
        %30 = vector.broadcast %cst_19 : f32 to vector<1x256xf32>
        %31 = arith.mulf %28, %30 : vector<1x256xf32>
        %cst_20 = arith.constant 1.562500e-02 : f32
        %32 = vector.broadcast %cst_20 : f32 to vector<1x256xf32>
        %33 = arith.mulf %29, %32 : vector<1x256xf32>
        %34 = arith.mulf %31, %31 : vector<1x256xf32>
        %35 = arith.subf %33, %34 : vector<1x256xf32>
        %cst_21 = arith.constant 0.000000e+00 : f32
        %36 = vector.broadcast %cst_21 : f32 to vector<1x256xf32>
        %37 = arith.maximumf %35, %36 : vector<1x256xf32>
        %cst_22 = arith.constant 9.99999974E-6 : f32
        %38 = vector.broadcast %cst_22 : f32 to vector<1x256xf32>
        %39 = arith.addf %37, %38 : vector<1x256xf32>
        %40 = math.rsqrt %39 : vector<1x256xf32>
        %c0_23 = arith.constant 0 : index
        %c0_24 = arith.constant 0 : index
        %41 = vector.load %arg7[%c0_23, %c0_24] : memref<1x256xf32, #tpu.memory_space<vmem>>, vector<1x256xf32>
        %42 = arith.mulf %41, %40 : vector<1x256xf32>
        %c0_25 = arith.constant 0 : index
        %c0_26 = arith.constant 0 : index
        %43 = vector.load %arg15[%c0_25, %c0_26] : memref<1x256xf32, #tpu.memory_space<vmem>>, vector<1x256xf32>
        tpu.vector_store %arg15[%c0_25, %c0_26], %42 {strides = array<i32>} : memref<1x256xf32, #tpu.memory_space<vmem>>, vector<1x256xf32>,
        %c0_27 = arith.constant 0 : index
        %c0_28 = arith.constant 0 : index
        %44 = vector.load %arg8[%c0_27, %c0_28] : memref<1x256xf32, #tpu.memory_space<vmem>>, vector<1x256xf32>
        %45 = arith.mulf %31, %42 : vector<1x256xf32>
        %46 = arith.subf %44, %45 : vector<1x256xf32>
        %c0_29 = arith.constant 0 : index
        %c0_30 = arith.constant 0 : index
        %47 = vector.load %arg16[%c0_29, %c0_30] : memref<1x256xf32, #tpu.memory_space<vmem>>, vector<1x256xf32>
        tpu.vector_store %arg16[%c0_29, %c0_30], %46 {strides = array<i32>} : memref<1x256xf32, #tpu.memory_space<vmem>>, vector<1x256xf32>,
      } else {
      }
      %11 = arith.index_cast %1 : i32 to index
      %c0 = arith.constant 0 : index
      %12 = vector.load %arg12[%11, %c0] : memref<64x256xf32, #tpu.memory_space<vmem>>, vector<64x256xf32>
      %c0_4 = arith.constant 0 : index
      %c0_5 = arith.constant 0 : index
      %13 = vector.load %arg15[%c0_4, %c0_5] : memref<1x256xf32, #tpu.memory_space<vmem>>, vector<1x256xf32>
      %14 = vector.broadcast %13 : vector<1x256xf32> to vector<64x256xf32>
      %15 = arith.mulf %12, %14 : vector<64x256xf32>
      %c0_6 = arith.constant 0 : index
      %c0_7 = arith.constant 0 : index
      %16 = vector.load %arg16[%c0_6, %c0_7] : memref<1x256xf32, #tpu.memory_space<vmem>>, vector<1x256xf32>
      %17 = vector.broadcast %16 : vector<1x256xf32> to vector<64x256xf32>
      %18 = arith.addf %15, %17 : vector<64x256xf32>
      %cst = arith.constant 0.000000e+00 : f32
      %19 = vector.broadcast %cst : f32 to vector<64x256xf32>
      %20 = arith.maximumf %18, %19 : vector<64x256xf32>
      %c0_8 = arith.constant 0 : index
      %c0_9 = arith.constant 0 : index
      %21 = vector.load %arg9[%c0_8, %c0_9] : memref<256x784xf32, #tpu.memory_space<vmem>>, vector<256x784xf32>
      %cst_10 = arith.constant dense<0.000000e+00> : vector<64x784xf32>
      %22 = tpu.matmul %20, %21, %cst_10 {dimension_numbers = #tpu.dot_dimension_numbers<[1], [0], [0], [1], [0, 0, 1, 1], [], []>} : vector<64x256xf32>, vector<256x784xf32>, vector<64x784xf32> -> vector<64x784xf32>
      %c0_11 = arith.constant 0 : index
      %c0_12 = arith.constant 0 : index
      %23 = vector.load %arg10[%c0_11, %c0_12] : memref<1x784xf32, #tpu.memory_space<vmem>>, vector<1x784xf32>
      %24 = vector.broadcast %23 : vector<1x784xf32> to vector<64x784xf32>
      %25 = arith.addf %22, %24 : vector<64x784xf32>
      %26 = math.tanh %25 : vector<64x784xf32>
      %c0_13 = arith.constant 0 : index
      %c0_14 = arith.constant 0 : index
      %27 = vector.load %arg11[%c0_13, %c0_14] : memref<64x784xf32, #tpu.memory_space<vmem>>, vector<64x784xf32>
      tpu.vector_store %arg11[%c0_13, %c0_14], %26 {strides = array<i32>} : memref<64x784xf32, #tpu.memory_space<vmem>>, vector<64x784xf32>,
    } else {
    }
    return
  }
  func.func @transform_0(%arg0: i32, %arg1: i32) -> (i32, i32) {
    %c1_i32 = arith.constant 1 : i32
    %0 = arith.subi %c1_i32, %arg0 : i32
    %1 = arith.muli %0, %arg1 : i32
    %c0_i32 = arith.constant 0 : i32
    %c0_i32_0 = arith.constant 0 : i32
    return %1, %c0_i32 : i32, i32
  }
  func.func @transform_1(%arg0: i32, %arg1: i32) -> (i32, i32) {
    %c0_i32 = arith.constant 0 : i32
    %c0_i32_0 = arith.constant 0 : i32
    %c0_i32_1 = arith.constant 0 : i32
    return %c0_i32, %c0_i32_0 : i32, i32
  }
  func.func @transform_2(%arg0: i32, %arg1: i32) -> (i32, i32) {
    %c0_i32 = arith.constant 0 : i32
    %c0_i32_0 = arith.constant 0 : i32
    %c0_i32_1 = arith.constant 0 : i32
    return %c0_i32, %c0_i32_0 : i32, i32
  }
  func.func @transform_3(%arg0: i32, %arg1: i32) -> (i32, i32) {
    %c0_i32 = arith.constant 0 : i32
    %c0_i32_0 = arith.constant 0 : i32
    %c0_i32_1 = arith.constant 0 : i32
    return %c0_i32, %c0_i32_0 : i32, i32
  }
  func.func @transform_4(%arg0: i32, %arg1: i32) -> (i32, i32) {
    %c0_i32 = arith.constant 0 : i32
    %c0_i32_0 = arith.constant 0 : i32
    %c0_i32_1 = arith.constant 0 : i32
    return %c0_i32, %c0_i32_0 : i32, i32
  }
  func.func @transform_5(%arg0: i32, %arg1: i32) -> (i32, i32) {
    %c0_i32 = arith.constant 0 : i32
    %c0_i32_0 = arith.constant 0 : i32
    %c0_i32_1 = arith.constant 0 : i32
    return %c0_i32, %c0_i32_0 : i32, i32
  }
  func.func @transform_6(%arg0: i32, %arg1: i32) -> (i32, i32) {
    %c0_i32 = arith.constant 0 : i32
    %c0_i32_0 = arith.constant 0 : i32
    %c0_i32_1 = arith.constant 0 : i32
    return %c0_i32, %c0_i32_0 : i32, i32
  }
  func.func @transform_7(%arg0: i32, %arg1: i32) -> (i32, i32) {
    %c0_i32 = arith.constant 0 : i32
    %c0_i32_0 = arith.constant 0 : i32
    %c0_i32_1 = arith.constant 0 : i32
    return %c0_i32, %c0_i32_0 : i32, i32
  }
  func.func @transform_8(%arg0: i32, %arg1: i32) -> (i32, i32) {
    %c0_i32 = arith.constant 0 : i32
    %c0_i32_0 = arith.constant 0 : i32
    %c0_i32_1 = arith.constant 0 : i32
    return %c0_i32, %c0_i32_0 : i32, i32
  }
  func.func @transform_9(%arg0: i32, %arg1: i32) -> (i32, i32) {
    %0 = arith.muli %arg0, %arg1 : i32
    %c0_i32 = arith.constant 0 : i32
    %c0_i32_0 = arith.constant 0 : i32
    return %0, %c0_i32 : i32, i32
  }
}

</mosaic_0001>

<bundles_post_ra>
// kernel: generator_forward.1
= control target key start
LH: loop header
LB: loop body
LE: loop exit
PB: predicated region body
PF: predicated region fallthrough
CT: control target
= control target key end

     0   :  { %14 = vsyncpa [#allocation8], 0  ;;  %s3755_s0 = inlined_call_operand.vmem [shape: f32[64,100], index: 0, kind: input, shape index: {}]   ;;  %s3756_s1 = inlined_call_operand.vmem [shape: f32[100,128], index: 1, kind: input, shape index: {}]   ;;  %s3757_s2 = inlined_call_operand.vmem [shape: f32[1,128], index: 2, kind: input, shape index: {}]   ;;  %s3758_s3 = inlined_call_operand.vmem [shape: f32[128,256], index: 3, kind: input, shape index: {}]   ;;  %s3759_s4 = inlined_call_operand.vmem [shape: f32[1,256], index: 4, kind: input, shape index: {}]   ;;  %s3760_s5 = inlined_call_operand.vmem [shape: f32[1,256], index: 5, kind: input, shape index: {}]   ;;  %s3761_s6 = inlined_call_operand.vmem [shape: f32[1,256], index: 6, kind: input, shape index: {}]   ;;  %s3762_s7 = inlined_call_operand.vmem [shape: f32[256,784], index: 7, kind: input, shape index: {}]   ;;  %s3763_s8 = inlined_call_operand.vmem [shape: f32[1,784], index: 8, kind: input, shape index: {}]   ;;  %s3764_s9 = inlined_call_operand.hbm [shape: f32[64,784], index: 9, kind: output, shape index: {}]  }
   0x1   :  { %16 = vsyncpa [#allocation8 + $0x1], 0  ;;  %s2549_s30 = smov 0   ;;  %s2551_s10 = smov 0  }
   0x2   :  { %s2553_s11 = smov 0  }
   0x3 LB: > { %s1869_s12 = sadd.s32 4294967295, %s2492_s11   ;;  %s1870_s13 = sadd.s32 4294967294, %s2492_s11   ;;  %s2492_s11 = sphi %s2553_s11, %s22_s11   ;;  %s2488_s10 = sphi %s2551_s10, %s3771_s10   ;;  %s2484_s30 = sphi %s2549_s30, %s3770_s30  }
   0x4   : > { %s34_s14 = sadd.s32 1, %s2488_s10  ;;  %p1874_p0 = scmp.ge.s32.totalorder %s2492_s11, 1 }
   0x5   : > { %p36_p1 = scmp.ge.s32.totalorder %s34_s14, 2  ;;  %p313_p2 = scmp.lt.s32.totalorder %s2492_s11, 3 }
   0x7   : > { %s3773_s14 = smov (%p36_p1, %s34_s14), 0  ;;  %p314_p3 = pnand %p1874_p0, %p313_p2 }
   0x8   : > { %p1875_p4 = scmp.ne.s32.totalorder (!%p314_p3), %s2484_s30, 0 }
   0x9   : > { %317 = sbr.rel (%p314_p3) target bundleno = 941 (0x3ad), region = 56 }
  0x10   : > { %367 = sbr.rel (%p1875_p4) target bundleno = 530 (0x212), region = 60  ;;  %v386_v0 = vld [vmem:[%s3756_s1] sm:$0xff] (!%p1875_p4)  ;;  %v387_v1 = vld [vmem:[%s3756_s1 + $0x8] sm:$0xff] (!%p1875_p4)  ;;  %v388_v2 = vld [vmem:[%s3756_s1 + $0x10] sm:$0xff] (!%p1875_p4)  ;;  %vm406_vm0 = vcmask (!%p1875_p4), 818176   ;;  %vm431_vm1 = vcmask (!%p1875_p4), 1043456  }
  0x11   : > { %v2006_v3 = vpack.c.bf16 (!%p1875_p4), %v387_v1, %v386_v0  ;;  %v389_v4 = vld [vmem:[%s3756_s1 + $0x18] sm:$0xff] (!%p1875_p4)  ;;  %v390_v6 = vld [vmem:[%s3756_s1 + $0x20] sm:$0xff] (!%p1875_p4)  ;;  %v391_v7 = vld [vmem:[%s3756_s1 + $0x28] sm:$0xff] (!%p1875_p4) }
  0x12   : > { %v2010_v5 = vpack.c.bf16 (!%p1875_p4), %v389_v4, %v388_v2  ;;  %v378_v8 = vld [vmem:[%s3755_s0] sm:$0xff] (!%p1875_p4)  ;;  %v2014_v9 = vpack.c.bf16 (!%p1875_p4), %v391_v7, %v390_v6  ;;  %v392_v10 = vld [vmem:[%s3756_s1 + $0x30] sm:$0xff] (!%p1875_p4)  ;;  %v393_v11 = vld [vmem:[%s3756_s1 + $0x38] sm:$0xff] (!%p1875_p4) }
  0x13   : > { %2007 = vmatprep.subr.bf16.mxu0 (!%p1875_p4), %v2006_v3  ;;  %1994 = vmatprep.mubr.msk.f32.mxu0 (!%p1875_p4), %vm406_vm0, %v378_v8  ;;  %v549_v12 = vld [vmem:[%s3758_s3 + $0x8] sm:$0xff] (!%p1875_p4)  ;;  %v551_v13 = vld [vmem:[%s3758_s3 + $0x18] sm:$0xff] (!%p1875_p4)  ;;  %v548_v14 = vld [vmem:[%s3758_s3] sm:$0xff] (!%p1875_p4)  ;;  %v2018_v19 = vpack.c.bf16 (!%p1875_p4), %v393_v11, %v392_v10  ;;  %v2494_v11 = vmov (!%p1875_p4), 0.0  }
  0x14   : > { %2009 = vmatpush3.bf16.msra.mxu0 (!%p1875_p4), %v2006_v3  ;;  %v2030_v15 = vpack.c.bf16 (!%p1875_p4), %v551_v13, %v549_v12  ;;  %v550_v16 = vld [vmem:[%s3758_s3 + $0x10] sm:$0xff] (!%p1875_p4)  ;;  %v553_v17 = vld [vmem:[%s3758_s3 + $0x28] sm:$0xff] (!%p1875_p4)  ;;  %v555_v18 = vld [vmem:[%s3758_s3 + $0x38] sm:$0xff] (!%p1875_p4)  ;;  %656 = vmatprep.mubr.f32.mxu1 (!%p1875_p4), %v2494_v11 }
  0x15   : > { %2011 = vmatprep.subr.bf16.mxu0 (!%p1875_p4), %v2010_v5  ;;  %v2032_v20 = vpack.c.bf16 (!%p1875_p4), %v550_v16, %v548_v14  ;;  %v2034_v21 = vpack.c.bf16 (!%p1875_p4), %v555_v18, %v553_v17  ;;  %v552_v22 = vld [vmem:[%s3758_s3 + $0x20] sm:$0xff] (!%p1875_p4)  ;;  %v554_v23 = vld [vmem:[%s3758_s3 + $0x30] sm:$0xff] (!%p1875_p4)  ;;  %v557_v24 = vld [vmem:[%s3758_s3 + $0x48] sm:$0xff] (!%p1875_p4) }
  0x16   : > { %v394_v25 = vld [vmem:[%s3756_s1 + $0x40] sm:$0xff] (!%p1875_p4)  ;;  %v395_v26 = vld [vmem:[%s3756_s1 + $0x48] sm:$0xff] (!%p1875_p4)  ;;  %2031 = vmatprep.subr.bf16.mxu1 (!%p1875_p4), %v2030_v15  ;;  %v559_v27 = vld [vmem:[%s3758_s3 + $0x58] sm:$0xff] (!%p1875_p4)  ;;  %v2036_v28 = vpack.c.bf16 (!%p1875_p4), %v554_v23, %v552_v22 }
  0x17   : > { %2033 = vmatpush1.bf16.msra.mxu1 %v2032_v20  ;;  %v2038_v29 = vpack.c.bf16 %v559_v27, %v557_v24  ;;  %v556_v30 = vld [vmem:[%s3758_s3 + $0x40] sm:$0xff]  ;;  %v558_v31 = vld [vmem:[%s3758_s3 + $0x50] sm:$0xff]  ;;  %v2022_v32 = vpack.c.bf16 %v395_v26, %v394_v25  ;;  %v561_v33 = vld [vmem:[%s3758_s3 + $0x68] sm:$0xff] }
  0x18   : > { %2013 = vmatpush3.bf16.msra.mxu0 %v2010_v5  ;;  %2035 = vmatprep.subr.bf16.mxu1 %v2034_v21  ;;  %v563_v34 = vld [vmem:[%s3758_s3 + $0x78] sm:$0xff]  ;;  %v396_v35 = vld [vmem:[%s3756_s1 + $0x50] sm:$0xff]  ;;  %v2040_v37 = vpack.c.bf16 %v558_v31, %v556_v30  ;;  %v560_v39 = vld [vmem:[%s3758_s3 + $0x60] sm:$0xff] }
  0x19   : > { %2015 = vmatprep.subr.bf16.mxu0 %v2014_v9  ;;  %v397_v36 = vld [vmem:[%s3756_s1 + $0x58] sm:$0xff]  ;;  %v2042_v38 = vpack.c.bf16 %v563_v34, %v561_v33  ;;  %v562_v40 = vld [vmem:[%s3758_s3 + $0x70] sm:$0xff]  ;;  %v565_v42 = vld [vmem:[%s3758_s3 + $0x88] sm:$0xff] }
  0x1a   : > { %v2026_v41 = vpack.c.bf16 %v397_v36, %v396_v35  ;;  %v567_v43 = vld [vmem:[%s3758_s3 + $0x98] sm:$0xff]  ;;  %v2044_v44 = vpack.c.bf16 %v562_v40, %v560_v39  ;;  %v564_v46 = vld [vmem:[%s3758_s3 + $0x80] sm:$0xff]  ;;  %v566_v47 = vld [vmem:[%s3758_s3 + $0x90] sm:$0xff] }
  0x1b   : > { %2037 = vmatpush1.bf16.msra.mxu1 %v2036_v28  ;;  %v2046_v45 = vpack.c.bf16 %v567_v43, %v565_v42  ;;  %v569_v48 = vld [vmem:[%s3758_s3 + $0xa8] sm:$0xff]  ;;  %v571_v49 = vld [vmem:[%s3758_s3 + $0xb8] sm:$0xff]  ;;  %v398_v50 = vld [vmem:[%s3756_s1 + $0x60] sm:$0xf]  ;;  %v2048_v51 = vpack.c.bf16 %v566_v47, %v564_v46 }
  0x1c   : > { %2017 = vmatpush3.bf16.msra.mxu0 %v2014_v9  ;;  %2039 = vmatprep.subr.bf16.mxu1 %v2038_v29  ;;  %v2050_v52 = vpack.c.bf16 %v571_v49, %v569_v48  ;;  %v568_v53 = vld [vmem:[%s3758_s3 + $0xa0] sm:$0xff]  ;;  %v570_v54 = vld [vmem:[%s3758_s3 + $0xb0] sm:$0xff]  ;;  %v573_v55 = vld [vmem:[%s3758_s3 + $0xc8] sm:$0xff] }
  0x1d   : > { %2019 = vmatprep.subr.bf16.mxu0 %v2018_v19  ;;  %v575_v56 = vld [vmem:[%s3758_s3 + $0xd8] sm:$0xff]  ;;  %v379_v57 = vld [vmem:[%s3755_s0 + $0x8] sm:$0xff]  ;;  %v380_v58 = vld [vmem:[%s3755_s0 + $0x10] sm:$0xff]  ;;  %v2052_v59 = vpack.c.bf16 %v570_v54, %v568_v53 }
  0x1e   : > { %v2054_v60 = vpack.c.bf16 %v575_v56, %v573_v55  ;;  %v572_v61 = vld [vmem:[%s3758_s3 + $0xc0] sm:$0xff]  ;;  %v574_v62 = vld [vmem:[%s3758_s3 + $0xd0] sm:$0xff]  ;;  %v381_v63 = vld [vmem:[%s3755_s0 + $0x18] sm:$0xff] }
  0x1f   : > { %2041 = vmatpush1.bf16.msra.mxu1 %v2040_v37  ;;  %v382_v0 = vld [vmem:[%s3755_s0 + $0x20] sm:$0xff]  ;;  %v2056_v1 = vpack.c.bf16 %v574_v62, %v572_v61  ;;  %v383_v2 = vld [vmem:[%s3755_s0 + $0x28] sm:$0xff]  ;;  %v384_v3 = vld [vmem:[%s3755_s0 + $0x30] sm:$0xff]  ;;  %v372_v37 = vlaneseq }
  0x20   : > { %2021 = vmatpush3.bf16.msra.mxu0 %v2018_v19  ;;  %2043 = vmatprep.subr.bf16.mxu1 %v2042_v38  ;;  %v385_v4 = vld [vmem:[%s3755_s0 + $0x38] sm:$0xff]  ;;  %v577_v5 = vld [vmem:[%s3758_s3 + $0xe8] sm:$0xff]  ;;  %v576_v8 = vld [vmem:[%s3758_s3 + $0xe0] sm:$0xff] }
  0x21   : > { %2023 = vmatprep.subr.bf16.mxu0 %v2022_v32  ;;  %v579_v6 = vld [vmem:[%s3758_s3 + $0xf8] sm:$0xff]  ;;  %v578_v9 = vld [vmem:[%s3758_s3 + $0xf0] sm:$0xff]  ;;  %v1876_v12 = vld [vmem:[%s3757_s2] ss:$0 sm:$0xff]  ;;  %vm2742_vm2 = vcmp.lt.s32.totalorder %v372_v37, 256  ;;  %v2750_v39 = vshrl.u32 %v372_v37, 7 }
  0x22   : > { %v2058_v7 = vpack.c.bf16 %v579_v6, %v577_v5  ;;  %v2060_v10 = vpack.c.bf16 %v578_v9, %v576_v8  ;;  %376 = vst.msk [vmem:[#allocation3] sm:$0x3] %vm2742_vm2, %v2494_v11  ;;  %377 = vst.msk [vmem:[#allocation4] sm:$0x3] %vm2742_vm2, %v2494_v11 }
  0x23   : > { %2045 = vmatpush1.bf16.msra.mxu1 %v2044_v44  ;;  %v584_v40 = vsub.s32 0, %v2750_v39  ;;  %v588_v42 = vsub.s32 1, %v2750_v39 }
  0x24   : > { %2025 = vmatpush3.bf16.msra.mxu0 %v2022_v32  ;;  %2047 = vmatprep.subr.bf16.mxu1 %v2046_v45 }
  0x25   : > { %2027 = vmatprep.subr.bf16.mxu0 %v2026_v41 }
  0x27   : > { %2049 = vmatpush1.bf16.msra.mxu1 %v2048_v51 }
  0x28   : > { %2029 = vmatpush3.bf16.msra.mxu0 %v2026_v41  ;;  %2051 = vmatprep.subr.bf16.mxu1 %v2050_v52  ;;  %v580_v41 = vld [vmem:[%s3759_s4] sm:$0x3] }
  0x29   : > { %1992 = vmatprep.subr.msk.mxu0 %vm431_vm1, %v398_v50  ;;  %v2757_v43 = vrot.slane %v580_v41, %v584_v40  ;;  %v2759_v44 = vrot.slane %v580_v41, %v588_v42 }
  0x2b   : > { %2053 = vmatpush1.bf16.msra.mxu1 %v2052_v59 }
  0x2c   : > { %1993 = vmatpush3.msk.msra.mxu0 %vm431_vm1, %v398_v50  ;;  %2055 = vmatprep.subr.bf16.mxu1 %v2054_v60 }
  0x2d   : > { %1995 = vmatmul.mubr.msk.f32.vlgmr.msra.gmra.mrb[0].mxu0 %vm406_vm0, %v379_v57 }
  0x2e   : > { %1997 = vmatprep.mubr.msk.f32.mxu0 %vm406_vm0, %v380_v58 }
  0x2f   : > { %2057 = vmatpush1.bf16.msra.mxu1 %v2056_v1 }
  0x30   : > { %2059 = vmatprep.subr.bf16.mxu1 %v2058_v7 }
  0x31   : > { %1998 = vmatmul.mubr.msk.f32.gmra.mrb[2].mxu0 %vm406_vm0, %v381_v63 }
  0x32   : > { %2000 = vmatprep.mubr.msk.f32.mxu0 %vm406_vm0, %v382_v0 }
  0x33   : > { %2061 = vmatpush1.bf16.msra.mxu1 %v2060_v10 }
  0x35   : > { %2001 = vmatmul.mubr.msk.f32.gmra.mrb[4].mxu0 %vm406_vm0, %v383_v2 }
  0x36   : > { %2003 = vmatprep.mubr.msk.f32.mxu0 %vm406_vm0, %v384_v3 }
  0x39   : > { %2004 = vmatmul.mubr.msk.f32.gmra.mrb[6].mxu0 %vm406_vm0, %v385_v4 }
 0x100   : > { %v1996_v13 = vpop.f32.mrb[0].mxu0 }
 0x101   : > { %v501_v14 = vpop.f32.mrb[1].mxu0  ;;  %v507_v16 = vadd.f32 %v1996_v13, %v1876_v12 }
 0x102   : > { %v502_v15 = vadd.f32 %v1876_v12, %v501_v14 }
 0x103   : > { %v541_v21 = vmax.f32 %v507_v16, 0.0 }
 0x104   : > { %v540_v17 = vmax.f32 %v502_v15, 0.0  ;;  %v1999_v18 = vpop.f32.mrb[2].mxu0 }
 0x105   : > { %v511_v19 = vpop.f32.mrb[3].mxu0  ;;  %v517_v25 = vadd.f32 %v1999_v18, %v1876_v12 }
 0x106   : > { %657 = vmatmul.mubr.f32.vlgmr.msra.gmra.mrb[0].mxu1 %v540_v17  ;;  %v512_v20 = vadd.f32 %v1876_v12, %v511_v19 }
 0x107   : > { %662 = vmatprep.mubr.f32.mxu1 %v2494_v11  ;;  %v543_v29 = vmax.f32 %v517_v25, 0.0 }
 0x108   : > { %v2002_v22 = vpop.f32.mrb[4].mxu0  ;;  %v542_v24 = vmax.f32 %v512_v20, 0.0 }
 0x109   : > { %v521_v23 = vpop.f32.mrb[5].mxu0  ;;  %v527_v31 = vadd.f32 %v2002_v22, %v1876_v12 }
 0x10a   : > { %663 = vmatmul.mubr.f32.gmra.mrb[2].mxu1 %v541_v21  ;;  %v522_v28 = vadd.f32 %v1876_v12, %v521_v23 }
 0x10b   : > { %668 = vmatprep.mubr.f32.mxu1 %v2494_v11  ;;  %v545_v33 = vmax.f32 %v527_v31, 0.0 }
 0x10c   : > { %v2005_v26 = vpop.f32.mrb[6].mxu0  ;;  %v544_v30 = vmax.f32 %v522_v28, 0.0 }
 0x10d   : > { %v531_v27 = vpop.f32.mrb[7].mxu0  ;;  %v537_v35 = vadd.f32 %v2005_v26, %v1876_v12 }
 0x10e   : > { %669 = vmatmul.mubr.f32.gmra.mrb[4].mxu1 %v542_v24  ;;  %v532_v32 = vadd.f32 %v1876_v12, %v531_v27 }
 0x10f   : > { %674 = vmatprep.mubr.f32.mxu1 %v2494_v11  ;;  %v547_v36 = vmax.f32 %v537_v35, 0.0 }
 0x110   : > { %v546_v34 = vmax.f32 %v532_v32, 0.0 }
 0x112   : > { %675 = vmatmul.mubr.f32.gmra.mrb[6].mxu1 %v543_v29 }
 0x113   : > { %680 = vmatprep.mubr.f32.mxu1 %v2494_v11 }
 0x116   : > { %681 = vmatmul.mubr.f32.gmra.mrb[8].mxu1 %v544_v30 }
 0x117   : > { %686 = vmatprep.mubr.f32.mxu1 %v2494_v11 }
 0x11a   : > { %687 = vmatmul.mubr.f32.gmra.mrb[10].mxu1 %v545_v33 }
 0x11b   : > { %692 = vmatprep.mubr.f32.mxu1 %v2494_v11 }
 0x11e   : > { %693 = vmatmul.mubr.f32.gmra.mrb[12].mxu1 %v546_v34 }
 0x11f   : > { %698 = vmatprep.mubr.f32.mxu1 %v2494_v11 }
 0x122   : > { %699 = vmatmul.mubr.f32.gmra.mrb[14].mxu1 %v547_v36 }
 0x1d9   : > { %v658_v45 = vpop.f32.mrb[0].mxu1 }
 0x1da   : > { %v659_v46 = vadd.f32 %v658_v45, %v2757_v43  ;;  %v660_v47 = vpop.f32.mrb[1].mxu1 }
 0x1db   : > { %v661_v48 = vadd.f32 %v660_v47, %v2759_v44 }
 0x1dc   : > { %710 = vst [vmem:[#allocation2] sm:$0xff] %v659_v46  ;;  %v778_v53 = vmul.f32 %v659_v46, %v659_v46 }
 0x1dd   : > { %711 = vst [vmem:[#allocation2 + $0x8] sm:$0xff] %v661_v48  ;;  %v664_v49 = vpop.f32.mrb[2].mxu1  ;;  %v779_v56 = vmul.f32 %v661_v48, %v661_v48 }
 0x1de   : > { %v665_v50 = vadd.f32 %v664_v49, %v2757_v43  ;;  %v666_v51 = vpop.f32.mrb[3].mxu1 }
 0x1df   : > { %v667_v52 = vadd.f32 %v666_v51, %v2759_v44 }
 0x1e0   : > { %712 = vst [vmem:[#allocation2 + $0x10] sm:$0xff] %v665_v50  ;;  %v727_v54 = vadd.f32 %v665_v50, %v659_v46  ;;  %v780_v55 = vmul.f32 %v665_v50, %v665_v50 }
 0x1e1   : > { %713 = vst [vmem:[#allocation2 + $0x18] sm:$0xff] %v667_v52  ;;  %v740_v57 = vadd.f32 %v667_v52, %v661_v48  ;;  %v781_v58 = vmul.f32 %v667_v52, %v667_v52  ;;  %v670_v59 = vpop.f32.mrb[4].mxu1 }
 0x1e2   : > { %v794_v60 = vadd.f32 %v780_v55, %v778_v53  ;;  %v671_v61 = vadd.f32 %v670_v59, %v2757_v43  ;;  %v672_v62 = vpop.f32.mrb[5].mxu1 }
 0x1e3   : > { %v807_v63 = vadd.f32 %v781_v58, %v779_v56  ;;  %v673_v0 = vadd.f32 %v672_v62, %v2759_v44 }
 0x1e4   : > { %714 = vst [vmem:[#allocation2 + $0x20] sm:$0xff] %v671_v61  ;;  %v728_v1 = vadd.f32 %v727_v54, %v671_v61  ;;  %v782_v2 = vmul.f32 %v671_v61, %v671_v61 }
 0x1e5   : > { %715 = vst [vmem:[#allocation2 + $0x28] sm:$0xff] %v673_v0  ;;  %v741_v3 = vadd.f32 %v740_v57, %v673_v0  ;;  %v783_v4 = vmul.f32 %v673_v0, %v673_v0  ;;  %v676_v5 = vpop.f32.mrb[6].mxu1 }
 0x1e6   : > { %v795_v6 = vadd.f32 %v794_v60, %v782_v2  ;;  %v677_v7 = vadd.f32 %v676_v5, %v2757_v43  ;;  %v678_v8 = vpop.f32.mrb[7].mxu1  ;;  %v2495_v2 = vmov 1966171168  }
 0x1e7   : > { %v808_v9 = vadd.f32 %v807_v63, %v783_v4  ;;  %v679_v10 = vadd.f32 %v678_v8, %v2759_v44 }
 0x1e8   : > { %716 = vst [vmem:[#allocation2 + $0x30] sm:$0xff] %v677_v7  ;;  %v729_v11 = vadd.f32 %v728_v1, %v677_v7  ;;  %v784_v12 = vmul.f32 %v677_v7, %v677_v7 }
 0x1e9   : > { %717 = vst [vmem:[#allocation2 + $0x38] sm:$0xff] %v679_v10  ;;  %v742_v13 = vadd.f32 %v741_v3, %v679_v10  ;;  %v785_v14 = vmul.f32 %v679_v10, %v679_v10  ;;  %v682_v15 = vpop.f32.mrb[8].mxu1  ;;  %v757_v3 = vunpack.c.l.s4 %v2495_v2 }
 0x1ea   : > { %v796_v16 = vadd.f32 %v795_v6, %v784_v12  ;;  %v683_v17 = vadd.f32 %v682_v15, %v2757_v43  ;;  %v684_v18 = vpop.f32.mrb[9].mxu1 }
 0x1eb   : > { %v809_v19 = vadd.f32 %v808_v9, %v785_v14  ;;  %v685_v20 = vadd.f32 %v684_v18, %v2759_v44  ;;  %v758_v10 = vunpack.c.0.s8 %v757_v3 }
 0x1ec   : > { %718 = vst [vmem:[#allocation2 + $0x40] sm:$0xff] %v683_v17  ;;  %v730_v21 = vadd.f32 %v729_v11, %v683_v17  ;;  %v786_v22 = vmul.f32 %v683_v17, %v683_v17 }
 0x1ed   : > { %719 = vst [vmem:[#allocation2 + $0x48] sm:$0xff] %v685_v20  ;;  %v743_v23 = vadd.f32 %v742_v13, %v685_v20  ;;  %v787_v24 = vmul.f32 %v685_v20, %v685_v20  ;;  %v688_v25 = vpop.f32.mrb[10].mxu1 }
 0x1ee   : > { %v797_v26 = vadd.f32 %v796_v16, %v786_v22  ;;  %v689_v27 = vadd.f32 %v688_v25, %v2757_v43  ;;  %v690_v28 = vpop.f32.mrb[11].mxu1 }
 0x1ef   : > { %v810_v29 = vadd.f32 %v809_v19, %v787_v24  ;;  %v691_v30 = vadd.f32 %v690_v28, %v2759_v44  ;;  %v761_v19 = vsub.s32 %v758_v10, %v2750_v39 }
 0x1f0   : > { %720 = vst [vmem:[#allocation2 + $0x50] sm:$0xff] %v689_v27  ;;  %v731_v31 = vadd.f32 %v730_v21, %v689_v27  ;;  %v788_v32 = vmul.f32 %v689_v27, %v689_v27 }
 0x1f1   : > { %721 = vst [vmem:[#allocation2 + $0x58] sm:$0xff] %v691_v30  ;;  %v744_v33 = vadd.f32 %v743_v23, %v691_v30  ;;  %v789_v34 = vmul.f32 %v691_v30, %v691_v30  ;;  %v694_v35 = vpop.f32.mrb[12].mxu1 }
 0x1f2   : > { %v798_v36 = vadd.f32 %v797_v26, %v788_v32  ;;  %v695_v37 = vadd.f32 %v694_v35, %v2757_v43  ;;  %v696_v40 = vpop.f32.mrb[13].mxu1  ;;  %v726_v26 = vld [vmem:[#allocation3] sm:$0x3] }
 0x1f3   : > { %v811_v41 = vadd.f32 %v810_v29, %v789_v34  ;;  %v697_v42 = vadd.f32 %v696_v40, %v2759_v44  ;;  %v777_v29 = vld [vmem:[#allocation4] sm:$0x3] }
 0x1f4   : > { %722 = vst [vmem:[#allocation2 + $0x60] sm:$0xff] %v695_v37  ;;  %v732_v45 = vadd.f32 %v731_v31, %v695_v37  ;;  %v790_v46 = vmul.f32 %v695_v37, %v695_v37 }
 0x1f5   : > { %723 = vst [vmem:[#allocation2 + $0x68] sm:$0xff] %v697_v42  ;;  %v745_v47 = vadd.f32 %v744_v33, %v697_v42  ;;  %v791_v48 = vmul.f32 %v697_v42, %v697_v42  ;;  %v700_v49 = vpop.f32.mrb[14].mxu1 }
 0x1f6   : > { %v799_v50 = vadd.f32 %v798_v36, %v790_v46  ;;  %v701_v51 = vadd.f32 %v700_v49, %v2757_v43  ;;  %v702_v52 = vpop.f32.mrb[15].mxu1 }
 0x1f7   : > { %v812_v53 = vadd.f32 %v811_v41, %v791_v48  ;;  %v703_v54 = vadd.f32 %v702_v52, %v2759_v44 }
 0x1f8   : > { %724 = vst [vmem:[#allocation2 + $0x70] sm:$0xff] %v701_v51  ;;  %v733_v55 = vadd.f32 %v732_v45, %v701_v51  ;;  %v792_v56 = vmul.f32 %v701_v51, %v701_v51 }
 0x1f9   : > { %725 = vst [vmem:[#allocation2 + $0x78] sm:$0xff] %v703_v54  ;;  %v746_v57 = vadd.f32 %v745_v47, %v703_v54  ;;  %v793_v58 = vmul.f32 %v703_v54, %v703_v54 }
 0x1fa   : > { %v734_v59 = vrot.slane %v733_v55, 4  ;;  %v800_v60 = vadd.f32 %v799_v50, %v792_v56 }
 0x1fb   : > { %v747_v61 = vrot.slane %v746_v57, 4  ;;  %v813_v62 = vadd.f32 %v812_v53, %v793_v58 }
 0x1fc   : > { %v735_v63 = vadd.f32 %v734_v59, %v733_v55  ;;  %v801_v0 = vrot.slane %v800_v60, 4 }
 0x1fd   : > { %v748_v1 = vadd.f32 %v747_v61, %v746_v57  ;;  %v814_v43 = vrot.slane %v813_v62, 4 }
 0x1fe   : > { %v736_v4 = vrot.slane %v735_v63, 2  ;;  %v802_v5 = vadd.f32 %v801_v0, %v800_v60 }
 0x1ff   : > { %v749_v6 = vrot.slane %v748_v1, 2  ;;  %v815_v44 = vadd.f32 %v814_v43, %v813_v62 }
 0x200   : > { %v737_v7 = vadd.f32 %v736_v4, %v735_v63  ;;  %v803_v8 = vrot.slane %v802_v5, 2 }
 0x201   : > { %v750_v9 = vadd.f32 %v749_v6, %v748_v1  ;;  %v816_v11 = vrot.slane %v815_v44, 2 }
 0x202   : > { %v738_v12 = vrot.slane %v737_v7, 1  ;;  %v804_v13 = vadd.f32 %v803_v8, %v802_v5 }
 0x203   : > { %v751_v14 = vrot.slane %v750_v9, 1  ;;  %v817_v15 = vadd.f32 %v816_v11, %v815_v44 }
 0x204   : > { %v739_v16 = vadd.f32 %v738_v12, %v737_v7  ;;  %v805_v17 = vrot.slane %v804_v13, 1 }
 0x205   : > { %v752_v18 = vadd.f32 %v751_v14, %v750_v9  ;;  %v818_v20 = vrot.slane %v817_v15, 1 }
 0x206   : > { %v806_v21 = vadd.f32 %v805_v17, %v804_v13 }
 0x207   : > { %v755_v22 = vcombine.low %v739_v16, %v752_v18  ;;  %v819_v23 = vadd.f32 %v818_v20, %v817_v15 }
 0x209   : > { %v762_v24 = vrot.slane %v755_v22, %v761_v19  ;;  %v822_v25 = vcombine.low %v806_v21, %v819_v23 }
 0x20b   : > { %v769_v27 = vrot.slane %v762_v24, %v761_v19  ;;  %v829_v28 = vrot.slane %v822_v25, %v761_v19 }
 0x20d   : > { %v771_v30 = vadd.f32 %v769_v27, %v726_v26  ;;  %v836_v31 = vrot.slane %v829_v28, %v761_v19 }
 0x20f   : > { %776 = vst.msk [vmem:[#allocation3] sm:$0x3] %vm2742_vm2, %v771_v30  ;;  %v838_v32 = vadd.f32 %v836_v31, %v777_v29 }
 0x211   : > { %839 = vst.msk [vmem:[#allocation4] sm:$0x3] %vm2742_vm2, %v838_v32 }
 0x212 PF: > { %p1886_p5 = scmp.ne.s32.totalorder %s2484_s30, 1 }
 0x213   : > { %v962_v39 = vld [vmem:[%s3762_s7 + $0x8] sm:$0xff] (!%p1886_p5)  ;;  %v969_v33 = vld [vmem:[%s3762_s7 + $0x40] sm:$0xff] (!%p1886_p5)  ;;  %v968_v38 = vld [vmem:[%s3762_s7 + $0x38] sm:$0xff] (!%p1886_p5)  ;;  %vm1728_vm4 = vcmask (!%p1886_p5), 130048  }
 0x214   : > { %843 = sbr.rel (%p1886_p5) target bundleno = 917 (0x395), region = 68  ;;  %v961_v34 = vld [vmem:[%s3762_s7] sm:$0xff] (!%p1886_p5)  ;;  %v2062_v35 = vpack.c.bf16 (!%p1886_p5), %v969_v33, %v962_v39  ;;  %v976_v36 = vld [vmem:[%s3762_s7 + $0x78] sm:$0xff] (!%p1886_p5)  ;;  %v983_v37 = vld [vmem:[%s3762_s7 + $0xb0] sm:$0xff] (!%p1886_p5) }
 0x215   : > { %v2064_v40 = vpack.c.bf16 (!%p1886_p5), %v968_v38, %v961_v34  ;;  %v2066_v41 = vpack.c.bf16 (!%p1886_p5), %v983_v37, %v976_v36  ;;  %v975_v42 = vld [vmem:[%s3762_s7 + $0x70] sm:$0xff] (!%p1886_p5)  ;;  %v982_v45 = vld [vmem:[%s3762_s7 + $0xa8] sm:$0xff] (!%p1886_p5)  ;;  %v997_v47 = vld [vmem:[%s3762_s7 + $0x120] sm:$0xff] (!%p1886_p5) }
 0x216   : > { %v990_v46 = vld [vmem:[%s3762_s7 + $0xe8] sm:$0xff] (!%p1886_p5)  ;;  %2063 = vmatprep.subr.bf16.mxu0 (!%p1886_p5), %v2062_v35  ;;  %v2068_v48 = vpack.c.bf16 (!%p1886_p5), %v982_v45, %v975_v42  ;;  %v989_v50 = vld [vmem:[%s3762_s7 + $0xe0] sm:$0xff] (!%p1886_p5)  ;;  %v996_v51 = vld [vmem:[%s3762_s7 + $0x118] sm:$0xff] (!%p1886_p5) }
 0x217   : > { %2065 = vmatpush1.bf16.msra.mxu0 (!%p1886_p5), %v2064_v40  ;;  %v2070_v49 = vpack.c.bf16 (!%p1886_p5), %v997_v47, %v990_v46  ;;  %v1004_v52 = vld [vmem:[%s3762_s7 + $0x158] sm:$0xff] (!%p1886_p5)  ;;  %v1011_v53 = vld [vmem:[%s3762_s7 + $0x190] sm:$0xff] (!%p1886_p5)  ;;  %v2072_v54 = vpack.c.bf16 (!%p1886_p5), %v996_v51, %v989_v50  ;;  %v1010_v57 = vld [vmem:[%s3762_s7 + $0x188] sm:$0xff] (!%p1886_p5) }
 0x218   : > { %2067 = vmatprep.subr.bf16.mxu0 (!%p1886_p5), %v2066_v41  ;;  %v2074_v55 = vpack.c.bf16 (!%p1886_p5), %v1011_v53, %v1004_v52  ;;  %v1003_v56 = vld [vmem:[%s3762_s7 + $0x150] sm:$0xff] (!%p1886_p5)  ;;  %v1018_v58 = vld [vmem:[%s3762_s7 + $0x1c8] sm:$0xff] (!%p1886_p5)  ;;  %v1025_v59 = vld [vmem:[%s3762_s7 + $0x200] sm:$0xff] (!%p1886_p5) }
 0x219   : > { %v964_v60 = vld [vmem:[%s3762_s7 + $0x18] sm:$0xff] (!%p1886_p5)  ;;  %v971_v61 = vld [vmem:[%s3762_s7 + $0x50] sm:$0xff] (!%p1886_p5)  ;;  %v970_v63 = vld [vmem:[%s3762_s7 + $0x48] sm:$0xff] (!%p1886_p5)  ;;  %v2076_v0 = vpack.c.bf16 (!%p1886_p5), %v1010_v57, %v1003_v56  ;;  %v2078_v4 = vpack.c.bf16 (!%p1886_p5), %v1025_v59, %v1018_v58 }
 0x21a   : > { %v963_v62 = vld [vmem:[%s3762_s7 + $0x10] sm:$0xff] (!%p1886_p5)  ;;  %v1017_v1 = vld [vmem:[%s3762_s7 + $0x1c0] sm:$0xff] (!%p1886_p5)  ;;  %v1024_v2 = vld [vmem:[%s3762_s7 + $0x1f8] sm:$0xff] (!%p1886_p5)  ;;  %v2126_v3 = vpack.c.bf16 (!%p1886_p5), %v971_v61, %v964_v60 }
 0x21b   : > { %2069 = vmatpush1.bf16.msra.mxu0 %v2068_v48  ;;  %v2128_v43 = vpack.c.bf16 %v970_v63, %v963_v62  ;;  %v1032_v5 = vld [vmem:[%s3762_s7 + $0x238] sm:$0xff]  ;;  %v978_v6 = vld [vmem:[%s3762_s7 + $0x88] sm:$0xff]  ;;  %v985_v44 = vld [vmem:[%s3762_s7 + $0xc0] sm:$0xff]  ;;  %v2080_v12 = vpack.c.bf16 %v1024_v2, %v1017_v1 }
 0x21c   : > { %2071 = vmatprep.subr.bf16.mxu0 %v2070_v49  ;;  %v1039_v7 = vld [vmem:[%s3762_s7 + $0x270] sm:$0xff]  ;;  %2127 = vmatprep.subr.bf16.mxu1 %v2126_v3  ;;  %v2130_v8 = vpack.c.bf16 %v985_v44, %v978_v6  ;;  %v977_v9 = vld [vmem:[%s3762_s7 + $0x80] sm:$0xff]  ;;  %v984_v10 = vld [vmem:[%s3762_s7 + $0xb8] sm:$0xff] }
 0x21d   : > { %2129 = vmatpush1.bf16.msra.mxu1 %v2128_v43  ;;  %v2132_v11 = vpack.c.bf16 %v984_v10, %v977_v9  ;;  %v992_v13 = vld [vmem:[%s3762_s7 + $0xf8] sm:$0xff]  ;;  %v999_v14 = vld [vmem:[%s3762_s7 + $0x130] sm:$0xff]  ;;  %v2082_v16 = vpack.c.bf16 %v1039_v7, %v1032_v5  ;;  %v1038_v18 = vld [vmem:[%s3762_s7 + $0x268] sm:$0xff] }
 0x21e   : > { %2131 = vmatprep.subr.bf16.mxu1 %v2130_v8  ;;  %v991_v15 = vld [vmem:[%s3762_s7 + $0xf0] sm:$0xff]  ;;  %v2134_v19 = vpack.c.bf16 %v999_v14, %v992_v13  ;;  %v998_v20 = vld [vmem:[%s3762_s7 + $0x128] sm:$0xff]  ;;  %v1053_v22 = vld [vmem:[%s3762_s7 + $0x2e0] sm:$0xff] }
 0x21f   : > { %2073 = vmatpush1.bf16.msra.mxu0 %v2072_v54  ;;  %v1031_v17 = vld [vmem:[%s3762_s7 + $0x230] sm:$0xff]  ;;  %v1046_v21 = vld [vmem:[%s3762_s7 + $0x2a8] sm:$0xff]  ;;  %v2136_v24 = vpack.c.bf16 %v998_v20, %v991_v15  ;;  %v1013_v25 = vld [vmem:[%s3762_s7 + $0x1a0] sm:$0xff] }
 0x220   : > { %2075 = vmatprep.subr.bf16.mxu0 %v2074_v55  ;;  %v1006_v23 = vld [vmem:[%s3762_s7 + $0x168] sm:$0xff]  ;;  %v2084_v26 = vpack.c.bf16 %v1038_v18, %v1031_v17  ;;  %v1045_v27 = vld [vmem:[%s3762_s7 + $0x2a0] sm:$0xff]  ;;  %v1012_v30 = vld [vmem:[%s3762_s7 + $0x198] sm:$0xff]  ;;  %v2086_v31 = vpack.c.bf16 %v1053_v22, %v1046_v21 }
 0x221   : > { %2133 = vmatpush1.bf16.msra.mxu1 %v2132_v11  ;;  %v2138_v28 = vpack.c.bf16 %v1013_v25, %v1006_v23  ;;  %v1005_v29 = vld [vmem:[%s3762_s7 + $0x160] sm:$0xff]  ;;  %v1052_v32 = vld [vmem:[%s3762_s7 + $0x2d8] sm:$0xff]  ;;  %v1027_v33 = vld [vmem:[%s3762_s7 + $0x210] sm:$0xff] }
 0x222   : > { %2135 = vmatprep.subr.bf16.mxu1 %v2134_v19  ;;  %v1020_v39 = vld [vmem:[%s3762_s7 + $0x1d8] sm:$0xff]  ;;  %v1067_v35 = vld [vmem:[%s3762_s7 + $0x350] sm:$0xff]  ;;  %v2140_v38 = vpack.c.bf16 %v1012_v30, %v1005_v29  ;;  %v2088_v36 = vpack.c.bf16 %v1052_v32, %v1045_v27  ;;  %v1026_v42 = vld [vmem:[%s3762_s7 + $0x208] sm:$0xff] }
 0x223   : > { %2077 = vmatpush1.bf16.msra.mxu0 %v2076_v0  ;;  %v1060_v34 = vld [vmem:[%s3762_s7 + $0x318] sm:$0xff]  ;;  %v1059_v37 = vld [vmem:[%s3762_s7 + $0x310] sm:$0xff]  ;;  %v2142_v40 = vpack.c.bf16 %v1027_v33, %v1020_v39  ;;  %v1066_v46 = vld [vmem:[%s3762_s7 + $0x348] sm:$0xff] }
 0x224   : > { %2079 = vmatprep.subr.bf16.mxu0 %v2078_v4  ;;  %v1019_v41 = vld [vmem:[%s3762_s7 + $0x1d0] sm:$0xff]  ;;  %v2090_v45 = vpack.c.bf16 %v1067_v35, %v1060_v34  ;;  %v1034_v47 = vld [vmem:[%s3762_s7 + $0x248] sm:$0xff]  ;;  %v1041_v48 = vld [vmem:[%s3762_s7 + $0x280] sm:$0xff]  ;;  %v2092_v52 = vpack.c.bf16 %v1066_v46, %v1059_v37 }
 0x225   : > { %2137 = vmatpush1.bf16.msra.mxu1 %v2136_v24  ;;  %v1074_v49 = vld [vmem:[%s3762_s7 + $0x388] sm:$0xff]  ;;  %v1081_v50 = vld [vmem:[%s3762_s7 + $0x3c0] sm:$0xff]  ;;  %v2144_v51 = vpack.c.bf16 %v1026_v42, %v1019_v41  ;;  %v2146_v54 = vpack.c.bf16 %v1041_v48, %v1034_v47  ;;  %v1040_v56 = vld [vmem:[%s3762_s7 + $0x278] sm:$0xff] }
 0x226   : > { %2139 = vmatprep.subr.bf16.mxu1 %v2138_v28  ;;  %v1073_v53 = vld [vmem:[%s3762_s7 + $0x380] sm:$0xff]  ;;  %v2094_v57 = vpack.c.bf16 %v1081_v50, %v1074_v49  ;;  %v1080_v58 = vld [vmem:[%s3762_s7 + $0x3b8] sm:$0xff]  ;;  %v1055_v60 = vld [vmem:[%s3762_s7 + $0x2f0] sm:$0xff] }
 0x227   : > { %2081 = vmatpush1.bf16.msra.mxu0 %v2080_v12  ;;  %v1033_v55 = vld [vmem:[%s3762_s7 + $0x240] sm:$0xff]  ;;  %v1048_v59 = vld [vmem:[%s3762_s7 + $0x2b8] sm:$0xff]  ;;  %v1095_v62 = vld [vmem:[%s3762_s7 + $0x430] sm:$0xff]  ;;  %v2096_v2 = vpack.c.bf16 %v1080_v58, %v1073_v53 }
 0x228   : > { %2083 = vmatprep.subr.bf16.mxu0 %v2082_v16  ;;  %v1088_v61 = vld [vmem:[%s3762_s7 + $0x3f8] sm:$0xff]  ;;  %v1087_v63 = vld [vmem:[%s3762_s7 + $0x3f0] sm:$0xff]  ;;  %v1094_v0 = vld [vmem:[%s3762_s7 + $0x428] sm:$0xff]  ;;  %v2148_v1 = vpack.c.bf16 %v1040_v56, %v1033_v55  ;;  %v2150_v3 = vpack.c.bf16 %v1055_v60, %v1048_v59 }
 0x229   : > { %2141 = vmatpush1.bf16.msra.mxu1 %v2140_v38  ;;  %v1047_v43 = vld [vmem:[%s3762_s7 + $0x2b0] sm:$0xff]  ;;  %v1054_v4 = vld [vmem:[%s3762_s7 + $0x2e8] sm:$0xff]  ;;  %v2098_v6 = vpack.c.bf16 %v1095_v62, %v1088_v61  ;;  %v1069_v44 = vld [vmem:[%s3762_s7 + $0x360] sm:$0xff]  ;;  %v2100_v14 = vpack.c.bf16 %v1094_v0, %v1087_v63 }
 0x22a   : > { %2143 = vmatprep.subr.bf16.mxu1 %v2142_v40  ;;  %v1062_v5 = vld [vmem:[%s3762_s7 + $0x328] sm:$0xff]  ;;  %v848_v7 = vld [vmem:[#allocation3] sm:$0x3]  ;;  %v849_v8 = vld [vmem:[#allocation4] sm:$0x3]  ;;  %v2152_v13 = vpack.c.bf16 %v1054_v4, %v1047_v43 }
 0x22b   : > { %2085 = vmatpush1.bf16.msra.mxu0 %v2084_v26  ;;  %v1102_v9 = vld [vmem:[%s3762_s7 + $0x468] sm:$0xff]  ;;  %v1109_v10 = vld [vmem:[%s3762_s7 + $0x4a0] sm:$0xff]  ;;  %v2999_v11 = vmul.f32 0.015625, %v848_v7  ;;  %v851_v12 = vmul.f32 0.015625, %v849_v8  ;;  %v2154_v16 = vpack.c.bf16 %v1069_v44, %v1062_v5  ;;  %v1068_v18 = vld [vmem:[%s3762_s7 + $0x358] sm:$0xff] }
 0x22c   : > { %2087 = vmatprep.subr.bf16.mxu0 %v2086_v31  ;;  %v1101_v15 = vld [vmem:[%s3762_s7 + $0x460] sm:$0xff]  ;;  %v2102_v20 = vpack.c.bf16 %v1109_v10, %v1102_v9  ;;  %v1108_v21 = vld [vmem:[%s3762_s7 + $0x498] sm:$0xff]  ;;  %v1083_v23 = vld [vmem:[%s3762_s7 + $0x3d0] sm:$0xff] }
 0x22d   : > { %2145 = vmatpush1.bf16.msra.mxu1 %v2144_v51  ;;  %v1061_v17 = vld [vmem:[%s3762_s7 + $0x320] sm:$0xff]  ;;  %v852_v19 = vmul.f32 %v2999_v11, %v2999_v11  ;;  %v1076_v22 = vld [vmem:[%s3762_s7 + $0x398] sm:$0xff]  ;;  %v1123_v25 = vld [vmem:[%s3762_s7 + $0x510] sm:$0xff]  ;;  %v2104_v28 = vpack.c.bf16 %v1108_v21, %v1101_v15 }
 0x22e   : > { %2147 = vmatprep.subr.bf16.mxu1 %v2146_v54  ;;  %v1116_v24 = vld [vmem:[%s3762_s7 + $0x4d8] sm:$0xff]  ;;  %v2156_v27 = vpack.c.bf16 %v1068_v18, %v1061_v17  ;;  %v1115_v29 = vld [vmem:[%s3762_s7 + $0x4d0] sm:$0xff]  ;;  %v2158_v30 = vpack.c.bf16 %v1083_v23, %v1076_v22  ;;  %v1082_v32 = vld [vmem:[%s3762_s7 + $0x3c8] sm:$0xff] }
 0x22f   : > { %2089 = vmatpush1.bf16.msra.mxu0 %v2088_v36  ;;  %v853_v26 = vsub.f32 %v851_v12, %v852_v19  ;;  %v1075_v31 = vld [vmem:[%s3762_s7 + $0x390] sm:$0xff]  ;;  %v2106_v33 = vpack.c.bf16 %v1123_v25, %v1116_v24  ;;  %v1122_v34 = vld [vmem:[%s3762_s7 + $0x508] sm:$0xff]  ;;  %v1097_v38 = vld [vmem:[%s3762_s7 + $0x440] sm:$0xff] }
 0x230   : > { %2091 = vmatprep.subr.bf16.mxu0 %v2090_v45  ;;  %v1090_v35 = vld [vmem:[%s3762_s7 + $0x408] sm:$0xff]  ;;  %v1137_v37 = vld [vmem:[%s3762_s7 + $0x580] sm:$0xff]  ;;  %v2160_v41 = vpack.c.bf16 %v1082_v32, %v1075_v31  ;;  %v2108_v42 = vpack.c.bf16 %v1122_v34, %v1115_v29  ;;  %v1096_v48 = vld [vmem:[%s3762_s7 + $0x438] sm:$0xff] }
 0x231   : > { %2149 = vmatpush1.bf16.msra.mxu1 %v2148_v1  ;;  %v854_v39 = vmax.f32 %v853_v26, 0.0  ;;  %v1130_v36 = vld [vmem:[%s3762_s7 + $0x548] sm:$0xff]  ;;  %v1129_v45 = vld [vmem:[%s3762_s7 + $0x540] sm:$0xff]  ;;  %v2162_v46 = vpack.c.bf16 %v1097_v38, %v1090_v35  ;;  %v1136_v50 = vld [vmem:[%s3762_s7 + $0x578] sm:$0xff] }
 0x232   : > { %2151 = vmatprep.subr.bf16.mxu1 %v2150_v3  ;;  %v1089_v47 = vld [vmem:[%s3762_s7 + $0x400] sm:$0xff]  ;;  %v2110_v49 = vpack.c.bf16 %v1137_v37, %v1130_v36  ;;  %v1104_v51 = vld [vmem:[%s3762_s7 + $0x478] sm:$0xff]  ;;  %v1151_v54 = vld [vmem:[%s3762_s7 + $0x5f0] sm:$0xff]  ;;  %v2112_v56 = vpack.c.bf16 %v1136_v50, %v1129_v45  ;;  %v859_v3 = vlaneseq }
 0x233   : > { %2093 = vmatpush1.bf16.msra.mxu0 %v2092_v52  ;;  %v855_v40 = vadd.f32 1e-05, %v854_v39  ;;  %v1111_v52 = vld [vmem:[%s3762_s7 + $0x4b0] sm:$0xff]  ;;  %v1144_v53 = vld [vmem:[%s3762_s7 + $0x5b8] sm:$0xff]  ;;  %v2164_v55 = vpack.c.bf16 %v1096_v48, %v1089_v47  ;;  %v1110_v60 = vld [vmem:[%s3762_s7 + $0x4a8] sm:$0xff] }
 0x234   : > { %2095 = vmatprep.subr.bf16.mxu0 %v2094_v57  ;;  %v1143_v57 = vld [vmem:[%s3762_s7 + $0x5b0] sm:$0xff]  ;;  %v2166_v58 = vpack.c.bf16 %v1111_v52, %v1104_v51  ;;  %v2114_v61 = vpack.c.bf16 %v1151_v54, %v1144_v53  ;;  %v1150_v62 = vld [vmem:[%s3762_s7 + $0x5e8] sm:$0xff]  ;;  %v1125_v0 = vld [vmem:[%s3762_s7 + $0x520] sm:$0xff]  ;;  %vm3126_vm3 = vcmp.lt.s32.totalorder %v859_v3, 256  ;;  %v3148_v29 = vshrl.u32 %v859_v3, 7 }
 0x235   : > { %2153 = vmatpush1.bf16.msra.mxu1 %v2152_v13  ;;  %2326 = vrsqrt.f32 %v855_v40  ;;  %v1103_v59 = vld [vmem:[%s3762_s7 + $0x470] sm:$0xff]  ;;  %v1118_v63 = vld [vmem:[%s3762_s7 + $0x4e8] sm:$0xff]  ;;  %v1157_v43 = vld [vmem:[%s3762_s7 + $0x620] sm:$0xff]  ;;  %v2116_v5 = vpack.c.bf16 %v1150_v62, %v1143_v57 }
 0x236   : > { %2155 = vmatprep.subr.bf16.mxu1 %v2154_v16  ;;  %v1158_v1 = vld [vmem:[%s3762_s7 + $0x628] sm:$0xff]  ;;  %v2168_v4 = vpack.c.bf16 %v1110_v60, %v1103_v59  ;;  %v2170_v44 = vpack.c.bf16 %v1125_v0, %v1118_v63  ;;  %v1117_v7 = vld [vmem:[%s3762_s7 + $0x4e0] sm:$0xff]  ;;  %v1124_v8 = vld [vmem:[%s3762_s7 + $0x518] sm:$0xff]  ;;  %v3171_v37 = vsub.s32 1, %v3148_v29  ;;  %v3174_v40 = vsub.s32 0, %v3148_v29 }
 0x237   : > { %2097 = vmatpush1.bf16.msra.mxu0 %v2096_v2  ;;  %v1165_v2 = vld [vmem:[%s3762_s7 + $0x660] sm:$0xff]  ;;  %v1164_v10 = vld [vmem:[%s3762_s7 + $0x658] sm:$0xff]  ;;  %v1139_v13 = vld [vmem:[%s3762_s7 + $0x590] sm:$0xff] }
 0x238   : > { %2099 = vmatprep.subr.bf16.mxu0 %v2098_v6  ;;  %v857_v6 = vld [vmem:[%s3760_s5] sm:$0x3]  ;;  %v2118_v9 = vpack.c.bf16 %v1165_v2, %v1158_v1  ;;  %v1132_v12 = vld [vmem:[%s3762_s7 + $0x558] sm:$0xff]  ;;  %v1179_v16 = vld [vmem:[%s3762_s7 + $0x6d0] sm:$0xff]  ;;  %v2120_v21 = vpack.c.bf16 %v1164_v10, %v1157_v43 }
 0x239   : > { %2157 = vmatpush1.bf16.msra.mxu1 %v2156_v27  ;;  %v1172_v15 = vld [vmem:[%s3762_s7 + $0x698] sm:$0xff]  ;;  %v1171_v18 = vld [vmem:[%s3762_s7 + $0x690] sm:$0xff]  ;;  %v864_v22 = vld [vmem:[%s3761_s6] sm:$0x3]  ;;  %v2174_v23 = vpack.c.bf16 %v1139_v13, %v1132_v12 }
 0x23a   : > { %2159 = vmatprep.subr.bf16.mxu1 %v2158_v30  ;;  %v1131_v24 = vld [vmem:[%s3762_s7 + $0x550] sm:$0xff]  ;;  %v1138_v25 = vld [vmem:[%s3762_s7 + $0x588] sm:$0xff]  ;;  %v2122_v26 = vpack.c.bf16 %v1179_v16, %v1172_v15  ;;  %v1153_v31 = vld [vmem:[%s3762_s7 + $0x600] sm:$0xff] }
 0x23b   : > { %2101 = vmatpush1.bf16.msra.mxu0 %v2100_v14  ;;  %v1178_v27 = vld [vmem:[%s3762_s7 + $0x6c8] sm:$0xff]  ;;  %v973_v39 = vld [vmem:[%s3762_s7 + $0x60] sm:$0xff]  ;;  %v1152_v36 = vld [vmem:[%s3762_s7 + $0x5f8] sm:$0xff] }
 0x23c   : > { %2103 = vmatprep.subr.bf16.mxu0 %v2102_v20  ;;  %v2172_v20 = vpack.c.bf16 %v1124_v8, %v1117_v7  ;;  %v1146_v30 = vld [vmem:[%s3762_s7 + $0x5c8] sm:$0xff]  ;;  %v2124_v34 = vpack.c.bf16 %v1178_v27, %v1171_v18  ;;  %v1145_v38 = vld [vmem:[%s3762_s7 + $0x5c0] sm:$0xff]  ;;  %v1167_v45 = vld [vmem:[%s3762_s7 + $0x670] sm:$0xff] }
 0x23d   : > { %2161 = vmatpush1.bf16.msra.mxu1 %v2160_v41  ;;  %v966_v32 = vld [vmem:[%s3762_s7 + $0x28] sm:$0xff]  ;;  %v2178_v35 = vpack.c.bf16 %v1153_v31, %v1146_v30  ;;  %v873_v47 = vld [vmem:[#allocation2] sm:$0xff]  ;;  %v2180_v48 = vpack.c.bf16 %v1152_v36, %v1145_v38  ;;  %v876_v53 = vld [vmem:[#allocation2 + $0x18] sm:$0xff] }
 0x23e   : > { %2163 = vmatprep.subr.bf16.mxu1 %v2162_v46  ;;  %v2190_v41 = vpack.c.bf16 %v973_v39, %v966_v32  ;;  %v874_v46 = vld [vmem:[#allocation2 + $0x8] sm:$0xff]  ;;  %v1181_v57 = vld [vmem:[%s3762_s7 + $0x6e0] sm:$0xff]  ;;  %v875_v62 = vld [vmem:[#allocation2 + $0x10] sm:$0xff] }
 0x23f   : > { %2105 = vmatpush1.bf16.msra.mxu0 %v2104_v28  ;;  %v2327_v14 = vpop.eup %2326  ;;  %v1166_v52 = vld [vmem:[%s3762_s7 + $0x668] sm:$0xff]  ;;  %v1173_v1 = vld [vmem:[%s3762_s7 + $0x6a0] sm:$0xff]  ;;  %v1180_v2 = vld [vmem:[%s3762_s7 + $0x6d8] sm:$0xff] }
 0x240   : > { %2107 = vmatprep.subr.bf16.mxu0 %v2106_v33  ;;  %v858_v19 = vmul.f32 %v2327_v14, %v857_v6  ;;  %v972_v6 = vld [vmem:[%s3762_s7 + $0x58] sm:$0xff]  ;;  %v1086_v7 = vld [vmem:[%s3762_s7 + $0x3e8] sm:$0xff]  ;;  %v987_v13 = vld [vmem:[%s3762_s7 + $0xd0] sm:$0xff]  ;;  %v2188_v14 = vpack.c.bf16 %v1180_v2, %v1173_v1 }
 0x241   : > { %2165 = vmatpush1.bf16.msra.mxu1 %v2164_v55  ;;  %v980_v12 = vld [vmem:[%s3762_s7 + $0x98] sm:$0xff]  ;;  %v877_v16 = vld [vmem:[#allocation2 + $0x20] sm:$0xff]  ;;  %v967_v17 = vld [vmem:[%s3762_s7 + $0x30] sm:$0xff] }
 0x242   : > { %2167 = vmatprep.subr.bf16.mxu1 %v2166_v58  ;;  %863 = vst.msk [vmem:[#allocation5] sm:$0x3] %vm3126_vm3, %v858_v19  ;;  %v865_v28 = vmul.f32 %v858_v19, %v2999_v11  ;;  %v2176_v11 = vpack.c.bf16 %v1138_v25, %v1131_v24  ;;  %v974_v18 = vld [vmem:[%s3762_s7 + $0x68] sm:$0xff]  ;;  %v1093_v24 = vld [vmem:[%s3762_s7 + $0x420] sm:$0xff]  ;;  %v1100_v25 = vld [vmem:[%s3762_s7 + $0x458] sm:$0xff]  ;;  %v2194_v27 = vpack.c.bf16 %v987_v13, %v980_v12 }
 0x243   : > { %2109 = vmatpush1.bf16.msra.mxu0 %v2108_v42  ;;  %v1160_v42 = vld [vmem:[%s3762_s7 + $0x638] sm:$0xff]  ;;  %v986_v30 = vld [vmem:[%s3762_s7 + $0xc8] sm:$0xff]  ;;  %v2258_v38 = vpack.c.bf16 %v1100_v25, %v1093_v24  ;;  %v981_v36 = vld [vmem:[%s3762_s7 + $0xa0] sm:$0xff] }
 0x244   : > { %2111 = vmatprep.subr.bf16.mxu0 %v2110_v49  ;;  %v866_v33 = vsub.f32 %v864_v22, %v865_v28  ;;  %v1159_v49 = vld [vmem:[%s3762_s7 + $0x630] sm:$0xff]  ;;  %v2182_v51 = vpack.c.bf16 %v1167_v45, %v1160_v42  ;;  %v994_v39 = vld [vmem:[%s3762_s7 + $0x108] sm:$0xff]  ;;  %v1016_v24 = vld [vmem:[%s3762_s7 + $0x1b8] sm:$0xff] }
 0x245   : > { %2169 = vmatpush1.bf16.msra.mxu1 %v2168_v4  ;;  %v2184_v60 = vpack.c.bf16 %v1166_v52, %v1159_v49  ;;  %v965_v4 = vld [vmem:[%s3762_s7 + $0x20] sm:$0xff]  ;;  %v979_v28 = vld [vmem:[%s3762_s7 + $0x90] sm:$0xff]  ;;  %v882_v49 = vld [vmem:[#allocation2 + $0x48] sm:$0xff] }
 0x246   : > { %2171 = vmatprep.subr.bf16.mxu1 %v2170_v44  ;;  %867 = vst.msk [vmem:[#allocation6] sm:$0x3] %vm3126_vm3, %v866_v33  ;;  %v1079_v44 = vld [vmem:[%s3762_s7 + $0x3b0] sm:$0xff]  ;;  %v2192_v22 = vpack.c.bf16 %v972_v6, %v965_v4  ;;  %v1001_v33 = vld [vmem:[%s3762_s7 + $0x140] sm:$0xff]  ;;  %v1000_v52 = vld [vmem:[%s3762_s7 + $0x138] sm:$0xff] }
 0x247   : > { %2113 = vmatpush1.bf16.msra.mxu0 %v2112_v56  ;;  %v1174_v56 = vld [vmem:[%s3762_s7 + $0x6a8] sm:$0xff]  ;;  %v1121_v6 = vld [vmem:[%s3762_s7 + $0x500] sm:$0xff] }
 0x248   : > { %2115 = vmatprep.subr.bf16.mxu0 %v2114_v61  ;;  %v2186_v0 = vpack.c.bf16 %v1181_v57, %v1174_v56  ;;  %v1002_v1 = vld [vmem:[%s3762_s7 + $0x148] sm:$0xff] }
 0x249   : > { %2173 = vmatpush1.bf16.msra.mxu1 %v2172_v20  ;;  %v889_v50 = vld [vmem:[#allocation5] sm:$0x3] }
 0x24a   : > { %2175 = vmatprep.subr.bf16.mxu1 %v2174_v23  ;;  %v3189_v54 = vrot.slane %v889_v50, %v3171_v37  ;;  %v3192_v55 = vrot.slane %v889_v50, %v3174_v40  ;;  %v2254_v23 = vpack.c.bf16 %v1086_v7, %v1079_v44  ;;  %v2198_v50 = vpack.c.bf16 %v1001_v33, %v994_v39  ;;  %v1128_v44 = vld [vmem:[%s3762_s7 + $0x538] sm:$0xff]  ;;  %v1021_v39 = vld [vmem:[%s3762_s7 + $0x1e0] sm:$0xff] }
 0x24b   : > { %2117 = vmatpush1.bf16.msra.mxu0 %v2116_v5  ;;  %v878_v5 = vld [vmem:[#allocation2 + $0x28] sm:$0xff]  ;;  %v884_v7 = vld [vmem:[#allocation2 + $0x58] sm:$0xff] }
 0x24c   : > { %2119 = vmatprep.subr.bf16.mxu0 %v2118_v9  ;;  %v902_v58 = vmul.f32 %v3189_v54, %v874_v46  ;;  %v901_v59 = vmul.f32 %v3192_v55, %v873_v47  ;;  %v904_v61 = vmul.f32 %v3189_v54, %v876_v53  ;;  %v903_v8 = vmul.f32 %v3192_v55, %v875_v62  ;;  %v1107_v47 = vld [vmem:[%s3762_s7 + $0x490] sm:$0xff]  ;;  %v1028_v33 = vld [vmem:[%s3762_s7 + $0x218] sm:$0xff] }
 0x24d   : > { %2177 = vmatpush1.bf16.msra.mxu1 %v2176_v11  ;;  %v917_v63 = vld [vmem:[#allocation6] sm:$0x3]  ;;  %v906_v19 = vmul.f32 %v3189_v54, %v878_v5  ;;  %v905_v32 = vmul.f32 %v3192_v55, %v877_v16  ;;  %v2256_v11 = vpack.c.bf16 %v974_v18, %v967_v17  ;;  %v2196_v46 = vpack.c.bf16 %v986_v30, %v979_v28  ;;  %v883_v18 = vld [vmem:[#allocation2 + $0x50] sm:$0xff]  ;;  %v1142_v30 = vld [vmem:[%s3762_s7 + $0x5a8] sm:$0xff] }
 0x24e   : > { %2179 = vmatprep.subr.bf16.mxu1 %v2178_v35  ;;  %v3210_v3 = vrot.slane %v917_v63, %v3171_v37  ;;  %v3213_v43 = vrot.slane %v917_v63, %v3174_v40  ;;  %v879_v35 = vld [vmem:[#allocation2 + $0x30] sm:$0xff]  ;;  %v910_v4 = vmul.f32 %v3189_v54, %v882_v49  ;;  %v1029_v16 = vld [vmem:[%s3762_s7 + $0x220] sm:$0xff]  ;;  %v1030_v49 = vld [vmem:[%s3762_s7 + $0x228] sm:$0xff] }
 0x24f   : > { %2121 = vmatpush1.bf16.msra.mxu0 %v2120_v21  ;;  %v907_v57 = vmul.f32 %v3192_v55, %v879_v35  ;;  %v1135_v28 = vld [vmem:[%s3762_s7 + $0x570] sm:$0xff] }
 0x250   : > { %2123 = vmatprep.subr.bf16.mxu0 %v2122_v26  ;;  %v930_v9 = vadd.f32 %v3210_v3, %v902_v58  ;;  %v929_v10 = vadd.f32 %v3213_v43, %v901_v59  ;;  %v932_v15 = vadd.f32 %v3210_v3, %v904_v61  ;;  %v880_v26 = vld [vmem:[#allocation2 + $0x38] sm:$0xff]  ;;  %v931_v31 = vadd.f32 %v3213_v43, %v903_v8  ;;  %v1015_v59 = vld [vmem:[%s3762_s7 + $0x1b0] sm:$0xff]  ;;  %v881_v61 = vld [vmem:[#allocation2 + $0x40] sm:$0xff] }
 0x251   : > { %2181 = vmatpush1.bf16.msra.mxu1 %v2180_v48  ;;  %v934_v42 = vadd.f32 %v3210_v3, %v906_v19  ;;  %v908_v45 = vmul.f32 %v3189_v54, %v880_v26  ;;  %v1114_v48 = vld [vmem:[%s3762_s7 + $0x4c8] sm:$0xff]  ;;  %v933_v56 = vadd.f32 %v3213_v43, %v905_v32  ;;  %v1008_v58 = vld [vmem:[%s3762_s7 + $0x178] sm:$0xff]  ;;  %v935_v13 = vadd.f32 %v3213_v43, %v907_v57 }
 0x252   : > { %2183 = vmatprep.subr.bf16.mxu1 %v2182_v51  ;;  %v3244_v20 = vmax.f32 %v930_v9, 0.0  ;;  %v3246_v21 = vmax.f32 %v929_v10, 0.0  ;;  %v993_v51 = vld [vmem:[%s3762_s7 + $0x100] sm:$0xff]  ;;  %v3294_v53 = vmax.f32 %v931_v31, 0.0  ;;  %v2262_v63 = vpack.c.bf16 %v1114_v48, %v1107_v47  ;;  %v1007_v9 = vld [vmem:[%s3762_s7 + $0x170] sm:$0xff]  ;;  %v1014_v10 = vld [vmem:[%s3762_s7 + $0x1a8] sm:$0xff] }
 0x253   : > { %2125 = vmatpush1.bf16.msra.mxu0 %v2124_v34  ;;  %v3269_v34 = vmax.f32 %v932_v15, 0.0  ;;  %v3306_v62 = vmax.f32 %v934_v42, 0.0  ;;  %v936_v2 = vadd.f32 %v3210_v3, %v908_v45  ;;  %v2200_v5 = vpack.c.bf16 %v1000_v52, %v993_v51  ;;  %v1022_v15 = vld [vmem:[%s3762_s7 + $0x1e8] sm:$0xff]  ;;  %v885_v45 = vld [vmem:[#allocation2 + $0x60] sm:$0xff]  ;;  %v1023_v48 = vld [vmem:[%s3762_s7 + $0x1f0] sm:$0xff] }
 0x254   : > { %2191 = vmatprep.subr.bf16.mxu0 %v2190_v41  ;;  %1286 = vmatprep.mubr.f32.mxu0 %v3244_v20  ;;  %v988_v41 = vld [vmem:[%s3762_s7 + $0xd8] sm:$0xff]  ;;  %v2202_v8 = vpack.c.bf16 %v1015_v59, %v1008_v58  ;;  %v3329_v12 = vmax.f32 %v933_v56, 0.0  ;;  %v938_v25 = vadd.f32 %v3210_v3, %v910_v4  ;;  %v912_v26 = vmul.f32 %v3189_v54, %v884_v7  ;;  %v886_v31 = vld [vmem:[#allocation2 + $0x68] sm:$0xff]  ;;  %v1149_v56 = vld [vmem:[%s3762_s7 + $0x5e0] sm:$0xff] }
 0x255   : > { %2185 = vmatpush1.bf16.msra.mxu1 %v2184_v60  ;;  %1399 = vmatprep.mubr.f32.mxu1 %v3244_v20  ;;  %v2260_v60 = vpack.c.bf16 %v988_v41, %v981_v36  ;;  %v3341_v19 = vmax.f32 %v936_v2, 0.0  ;;  %v2206_v32 = vpack.c.bf16 %v1029_v16, %v1022_v15  ;;  %v1036_v36 = vld [vmem:[%s3762_s7 + $0x258] sm:$0xff]  ;;  %v1043_v41 = vld [vmem:[%s3762_s7 + $0x290] sm:$0xff]  ;;  %v2270_v47 = vpack.c.bf16 %v1142_v30, %v1135_v28  ;;  %v1050_v2 = vld [vmem:[%s3762_s7 + $0x2c8] sm:$0xff] }
 0x256   : > { %2187 = vmatprep.subr.bf16.mxu1 %v2186_v0  ;;  %1287 = vmatmul.mubr.f32.vlgmr.msra.gmra.mrb[0].mxu0 %v3246_v21  ;;  %v995_v0 = vld [vmem:[%s3762_s7 + $0x110] sm:$0xff]  ;;  %v914_v51 = vmul.f32 %v3189_v54, %v886_v31  ;;  %v2208_v52 = vpack.c.bf16 %v1028_v33, %v1021_v39  ;;  %v1156_v57 = vld [vmem:[%s3762_s7 + $0x618] sm:$0xff]  ;;  %v2210_v59 = vpack.c.bf16 %v1043_v41, %v1036_v36  ;;  %v1057_v4 = vld [vmem:[%s3762_s7 + $0x300] sm:$0xff] }
 0x257   : > { %2193 = vmatpush1.bf16.msra.mxu0 %v2192_v22  ;;  %1292 = vmatprep.mubr.f32.mxu0 %v3269_v34  ;;  %v2264_v17 = vpack.c.bf16 %v1002_v1, %v995_v0  ;;  %v2266_v22 = vpack.c.bf16 %v1128_v44, %v1121_v6  ;;  %v888_v58 = vld [vmem:[#allocation2 + $0x78] sm:$0xff]  ;;  %v913_v1 = vmul.f32 %v3192_v55, %v885_v45  ;;  %v887_v6 = vld [vmem:[#allocation2 + $0x70] sm:$0xff]  ;;  %v1170_v16 = vld [vmem:[%s3762_s7 + $0x688] sm:$0xff] }
 0x258   : > { %2195 = vmatprep.subr.bf16.mxu0 %v2194_v27  ;;  %v2204_v27 = vpack.c.bf16 %v1014_v10, %v1007_v9  ;;  %v2274_v7 = vpack.c.bf16 %v1156_v57, %v1149_v56  ;;  %v1044_v9 = vld [vmem:[%s3762_s7 + $0x298] sm:$0xff]  ;;  %v942_v10 = vadd.f32 %v3210_v3, %v914_v51  ;;  %v1163_v15 = vld [vmem:[%s3762_s7 + $0x650] sm:$0xff]  ;;  %v1058_v31 = vld [vmem:[%s3762_s7 + $0x308] sm:$0xff] }
 0x259   : > { %2189 = vmatpush1.bf16.msra.mxu1 %v2188_v14  ;;  %v909_v14 = vmul.f32 %v3192_v55, %v881_v61  ;;  %v1042_v61 = vld [vmem:[%s3762_s7 + $0x288] sm:$0xff]  ;;  %v2278_v30 = vpack.c.bf16 %v1170_v16, %v1163_v15  ;;  %v1177_v33 = vld [vmem:[%s3762_s7 + $0x6c0] sm:$0xff]  ;;  %v1063_v36 = vld [vmem:[%s3762_s7 + $0x330] sm:$0xff] }
 0x25a   : > { %2255 = vmatprep.subr.bf16.mxu1 %v2254_v23  ;;  %1293 = vmatmul.mubr.f32.gmra.mrb[2].mxu0 %v3294_v53  ;;  %v1009_v23 = vld [vmem:[%s3762_s7 + $0x180] sm:$0xff]  ;;  %v3449_v28 = vmax.f32 %v942_v10, 0.0  ;;  %v1078_v45 = vld [vmem:[%s3762_s7 + $0x3a8] sm:$0xff]  ;;  %v1072_v51 = vld [vmem:[%s3762_s7 + $0x378] sm:$0xff] }
 0x25b   : > { %2197 = vmatpush1.bf16.msra.mxu0 %v2196_v46  ;;  %1298 = vmatprep.mubr.f32.mxu0 %v3306_v62  ;;  %v937_v35 = vadd.f32 %v3213_v43, %v909_v14  ;;  %v2268_v42 = vpack.c.bf16 %v1016_v24, %v1009_v23  ;;  %v3377_v46 = vmax.f32 %v938_v25, 0.0  ;;  %v941_v23 = vadd.f32 %v3213_v43, %v913_v1  ;;  %v1064_v25 = vld [vmem:[%s3762_s7 + $0x338] sm:$0xff]  ;;  %v1077_v57 = vld [vmem:[%s3762_s7 + $0x3a0] sm:$0xff] }
 0x25c   : > { %1400 = vmatmul.mubr.f32.vlgmr.msra.gmra.mrb[0].mxu1 %v3246_v21  ;;  %2199 = vmatprep.subr.bf16.mxu0 %v2198_v50  ;;  %v940_v50 = vadd.f32 %v3210_v3, %v912_v26  ;;  %v915_v24 = vmul.f32 %v3192_v55, %v887_v6  ;;  %v1071_v26 = vld [vmem:[%s3762_s7 + $0x370] sm:$0xff]  ;;  %v1106_v6 = vld [vmem:[%s3762_s7 + $0x488] sm:$0xff]  ;;  %v1105_v10 = vld [vmem:[%s3762_s7 + $0x480] sm:$0xff] }
 0x25d   : > { %2257 = vmatpush3.bf16.msra.mxu1 %v2256_v11  ;;  %1405 = vmatprep.mubr.f32.mxu1 %v3269_v34  ;;  %v3365_v11 = vmax.f32 %v935_v13, 0.0  ;;  %v916_v13 = vmul.f32 %v3189_v54, %v888_v58  ;;  %v1056_v54 = vld [vmem:[%s3762_s7 + $0x2f8] sm:$0xff]  ;;  %v3472_v41 = vmax.f32 %v941_v23, 0.0  ;;  %v1141_v23 = vld [vmem:[%s3762_s7 + $0x5a0] sm:$0xff] }
 0x25e   : > { %2259 = vmatprep.subr.bf16.mxu1 %v2258_v38  ;;  %v911_v38 = vmul.f32 %v3192_v55, %v883_v18  ;;  %1299 = vmatmul.mubr.f32.gmra.mrb[4].mxu0 %v3329_v12  ;;  %v3413_v44 = vmax.f32 %v940_v50, 0.0  ;;  %v1049_v18 = vld [vmem:[%s3762_s7 + $0x2c0] sm:$0xff]  ;;  %v1051_v55 = vld [vmem:[%s3762_s7 + $0x2d0] sm:$0xff]  ;;  %v1084_v58 = vld [vmem:[%s3762_s7 + $0x3d8] sm:$0xff] }
 0x25f   : > { %2201 = vmatpush1.bf16.msra.mxu0 %v2200_v5  ;;  %1304 = vmatprep.mubr.f32.mxu0 %v3341_v19  ;;  %v2272_v5 = vpack.c.bf16 %v1030_v49, %v1023_v48  ;;  %v2216_v39 = vpack.c.bf16 %v1056_v54, %v1049_v18  ;;  %v2280_v48 = vpack.c.bf16 %v1058_v31, %v1051_v55  ;;  %v1126_v18 = vld [vmem:[%s3762_s7 + $0x528] sm:$0xff]  ;;  %v1155_v55 = vld [vmem:[%s3762_s7 + $0x610] sm:$0xff] }
 0x260   : > { %1406 = vmatmul.mubr.f32.gmra.mrb[2].mxu1 %v3294_v53  ;;  %2203 = vmatprep.subr.bf16.mxu0 %v2202_v8  ;;  %v939_v0 = vadd.f32 %v3213_v43, %v911_v38  ;;  %v1037_v8 = vld [vmem:[%s3762_s7 + $0x260] sm:$0xff]  ;;  %v2218_v38 = vpack.c.bf16 %v1071_v26, %v1064_v25  ;;  %v2224_v1 = vpack.c.bf16 %v1084_v58, %v1077_v57  ;;  %v1134_v54 = vld [vmem:[%s3762_s7 + $0x568] sm:$0xff] }
 0x261   : > { %2261 = vmatpush3.bf16.msra.mxu1 %v2260_v60  ;;  %1411 = vmatprep.mubr.f32.mxu1 %v3306_v62  ;;  %v1035_v60 = vld [vmem:[%s3762_s7 + $0x250] sm:$0xff]  ;;  %v2238_v25 = vpack.c.bf16 %v1141_v23, %v1134_v54  ;;  %v1133_v26 = vld [vmem:[%s3762_s7 + $0x560] sm:$0xff] }
 0x262   : > { %2263 = vmatprep.subr.bf16.mxu1 %v2262_v63  ;;  %v3401_v63 = vmax.f32 %v937_v35, 0.0  ;;  %1305 = vmatmul.mubr.f32.gmra.mrb[6].mxu0 %v3365_v11  ;;  %v2212_v14 = vpack.c.bf16 %v1042_v61, %v1035_v60  ;;  %v1184_v35 = vld [vmem:[%s3762_s7 + $0x6f8] sm:$0xff]  ;;  %v1099_v61 = vld [vmem:[%s3762_s7 + $0x450] sm:$0xff] }
 0x263   : > { %2205 = vmatpush1.bf16.msra.mxu0 %v2204_v27  ;;  %1310 = vmatprep.mubr.f32.mxu0 %v3377_v46  ;;  %v2276_v27 = vpack.c.bf16 %v1044_v9, %v1037_v8  ;;  %v2282_v50 = vpack.c.bf16 %v1184_v35, %v1177_v33  ;;  %v1092_v60 = vld [vmem:[%s3762_s7 + $0x418] sm:$0xff]  ;;  %v1154_v33 = vld [vmem:[%s3762_s7 + $0x608] sm:$0xff] }
 0x264   : > { %1412 = vmatmul.mubr.f32.gmra.mrb[4].mxu1 %v3329_v12  ;;  %2207 = vmatprep.subr.bf16.mxu0 %v2206_v32  ;;  %v944_v32 = vadd.f32 %v3210_v3, %v916_v13  ;;  %v1070_v3 = vld [vmem:[%s3762_s7 + $0x368] sm:$0xff]  ;;  %v1112_v13 = vld [vmem:[%s3762_s7 + $0x4b8] sm:$0xff] }
 0x265   : > { %2265 = vmatpush3.bf16.msra.mxu1 %v2264_v17  ;;  %1417 = vmatprep.mubr.f32.mxu1 %v3341_v19  ;;  %v2214_v17 = vpack.c.bf16 %v1057_v4, %v1050_v2  ;;  %v2226_v2 = vpack.c.bf16 %v1099_v61, %v1092_v60  ;;  %v1091_v4 = vld [vmem:[%s3762_s7 + $0x410] sm:$0xff]  ;;  %v2232_v15 = vpack.c.bf16 %v1112_v13, %v1105_v10  ;;  %v1162_v35 = vld [vmem:[%s3762_s7 + $0x648] sm:$0xff] }
 0x266   : > { %2267 = vmatprep.subr.bf16.mxu1 %v2266_v22  ;;  %v3437_v22 = vmax.f32 %v939_v0, 0.0  ;;  %1311 = vmatmul.mubr.f32.gmra.mrb[8].mxu0 %v3401_v63  ;;  %v3483_v49 = vmax.f32 %v944_v32, 0.0 }
 0x267   : > { %2209 = vmatpush1.bf16.msra.mxu0 %v2208_v52  ;;  %1316 = vmatprep.mubr.f32.mxu0 %v3413_v44  ;;  %v2220_v52 = vpack.c.bf16 %v1070_v3, %v1063_v36 }
 0x268   : > { %1418 = vmatmul.mubr.f32.gmra.mrb[6].mxu1 %v3365_v11  ;;  %2211 = vmatprep.subr.bf16.mxu0 %v2210_v59 }
 0x269   : > { %2269 = vmatpush3.bf16.msra.mxu1 %v2268_v42  ;;  %1423 = vmatprep.mubr.f32.mxu1 %v3377_v46  ;;  %v943_v42 = vadd.f32 %v3213_v43, %v915_v24  ;;  %v1065_v43 = vld [vmem:[%s3762_s7 + $0x340] sm:$0xff] }
 0x26a   : > { %2271 = vmatprep.subr.bf16.mxu1 %v2270_v47  ;;  %v1085_v47 = vld [vmem:[%s3762_s7 + $0x3e0] sm:$0xff]  ;;  %1317 = vmatmul.mubr.f32.gmra.mrb[10].mxu0 %v3437_v22  ;;  %v2284_v0 = vpack.c.bf16 %v1072_v51, %v1065_v43  ;;  %v1175_v51 = vld [vmem:[%s3762_s7 + $0x6b0] sm:$0xff] }
 0x26b   : > { %2213 = vmatpush1.bf16.msra.mxu0 %v2212_v14  ;;  %1322 = vmatprep.mubr.f32.mxu0 %v3449_v28  ;;  %v2222_v56 = vpack.c.bf16 %v1085_v47, %v1078_v45  ;;  %v3499_v59 = vmax.f32 %v943_v42, 0.0  ;;  %v1120_v14 = vld [vmem:[%s3762_s7 + $0x4f8] sm:$0xff]  ;;  %v1161_v42 = vld [vmem:[%s3762_s7 + $0x640] sm:$0xff] }
 0x26c   : > { %1424 = vmatmul.mubr.f32.gmra.mrb[8].mxu1 %v3401_v63  ;;  %2215 = vmatprep.subr.bf16.mxu0 %v2214_v17  ;;  %v1119_v17 = vld [vmem:[%s3762_s7 + $0x4f0] sm:$0xff]  ;;  %v1168_v45 = vld [vmem:[%s3762_s7 + $0x678] sm:$0xff] }
 0x26d   : > { %2273 = vmatpush3.bf16.msra.mxu1 %v2272_v5  ;;  %1429 = vmatprep.mubr.f32.mxu1 %v3413_v44  ;;  %v1098_v5 = vld [vmem:[%s3762_s7 + $0x448] sm:$0xff]  ;;  %v2236_v24 = vpack.c.bf16 %v1126_v18, %v1119_v17  ;;  %v1176_v47 = vld [vmem:[%s3762_s7 + $0x6b8] sm:$0xff] }
 0x26e   : > { %2275 = vmatprep.subr.bf16.mxu1 %v2274_v7  ;;  %1323 = vmatmul.mubr.f32.gmra.mrb[12].mxu0 %v3472_v41  ;;  %v1113_v7 = vld [vmem:[%s3762_s7 + $0x4c0] sm:$0xff]  ;;  %v2228_v8 = vpack.c.bf16 %v1098_v5, %v1091_v4 }
 0x26f   : > { %2217 = vmatpush1.bf16.msra.mxu0 %v2216_v39  ;;  %1328 = vmatprep.mubr.f32.mxu0 %v3483_v49  ;;  %v2230_v9 = vpack.c.bf16 %v1113_v7, %v1106_v6  ;;  %v1147_v39 = vld [vmem:[%s3762_s7 + $0x5d0] sm:$0xff] }
 0x270   : > { %1430 = vmatmul.mubr.f32.gmra.mrb[10].mxu1 %v3437_v22  ;;  %2219 = vmatprep.subr.bf16.mxu0 %v2218_v38  ;;  %v1169_v38 = vld [vmem:[%s3762_s7 + $0x680] sm:$0xff]  ;;  %v2244_v36 = vpack.c.bf16 %v1154_v33, %v1147_v39 }
 0x271   : > { %2277 = vmatpush3.bf16.msra.mxu1 %v2276_v27  ;;  %1435 = vmatprep.mubr.f32.mxu1 %v3449_v28  ;;  %v1140_v27 = vld [vmem:[%s3762_s7 + $0x598] sm:$0xff]  ;;  %v2246_v3 = vpack.c.bf16 %v1169_v38, %v1162_v35 }
 0x272   : > { %2279 = vmatprep.subr.bf16.mxu1 %v2278_v30  ;;  %1329 = vmatmul.mubr.f32.gmra.mrb[14].mxu0 %v3499_v59  ;;  %v1148_v30 = vld [vmem:[%s3762_s7 + $0x5d8] sm:$0xff]  ;;  %v2240_v31 = vpack.c.bf16 %v1140_v27, %v1133_v26 }
 0x273   : > { %2221 = vmatpush1.bf16.msra.mxu0 %v2220_v52  ;;  %1512 = vmatprep.mubr.f32.mxu0 %v3244_v20  ;;  %v2242_v32 = vpack.c.bf16 %v1155_v55, %v1148_v30  ;;  %v1182_v52 = vld [vmem:[%s3762_s7 + $0x6e8] sm:$0xff] }
 0x274   : > { %1436 = vmatmul.mubr.f32.gmra.mrb[12].mxu1 %v3472_v41  ;;  %2223 = vmatprep.subr.bf16.mxu0 %v2222_v56  ;;  %v2252_v56 = vpack.c.bf16 %v1182_v52, %v1175_v51 }
 0x275   : > { %2281 = vmatpush3.bf16.msra.mxu1 %v2280_v48  ;;  %1441 = vmatprep.mubr.f32.mxu1 %v3483_v49  ;;  %v1183_v48 = vld [vmem:[%s3762_s7 + $0x6f0] sm:$0xff] }
 0x276   : > { %2283 = vmatprep.subr.bf16.mxu1 %v2282_v50  ;;  %v2248_v50 = vpack.c.bf16 %v1168_v45, %v1161_v42  ;;  %v2250_v43 = vpack.c.bf16 %v1183_v48, %v1176_v47 }
 0x277   : > { %2225 = vmatpush1.bf16.msra.mxu0 %v2224_v1 }
 0x278   : > { %1442 = vmatmul.mubr.f32.gmra.mrb[14].mxu1 %v3499_v59  ;;  %2227 = vmatprep.subr.bf16.mxu0 %v2226_v2 }
 0x279   : > { %2285 = vmatpush3.bf16.msra.mxu1 %v2284_v0  ;;  %1625 = vmatprep.mubr.f32.mxu1 %v3244_v20  ;;  %v1127_v20 = vld [vmem:[%s3762_s7 + $0x530] sm:$0xff] }
 0x27a   : > { %v2234_v16 = vpack.c.bf16 %v1127_v20, %v1120_v14 }
 0x27b   : > { %2229 = vmatpush1.bf16.msra.mxu0 %v2228_v8 }
 0x27c   : > { %1626 = vmatmul.mubr.f32.vlgmr.msra.gmra.mrb[16].mxu1 %v3246_v21  ;;  %2231 = vmatprep.subr.bf16.mxu0 %v2230_v9 }
 0x27d   : > { %1630 = vmatprep.mubr.f32.mxu1 %v3269_v34 }
 0x27f   : > { %2233 = vmatpush1.bf16.msra.mxu0 %v2232_v15 }
 0x280   : > { %1631 = vmatmul.mubr.f32.gmra.mrb[18].mxu1 %v3294_v53  ;;  %2235 = vmatprep.subr.bf16.mxu0 %v2234_v16 }
 0x281   : > { %1635 = vmatprep.mubr.f32.mxu1 %v3306_v62 }
 0x283   : > { %2237 = vmatpush1.bf16.msra.mxu0 %v2236_v24 }
 0x284   : > { %1636 = vmatmul.mubr.f32.gmra.mrb[20].mxu1 %v3329_v12  ;;  %2239 = vmatprep.subr.bf16.mxu0 %v2238_v25 }
 0x285   : > { %1640 = vmatprep.mubr.f32.mxu1 %v3341_v19 }
 0x287   : > { %2241 = vmatpush1.bf16.msra.mxu0 %v2240_v31 }
 0x288   : > { %1641 = vmatmul.mubr.f32.gmra.mrb[22].mxu1 %v3365_v11  ;;  %2243 = vmatprep.subr.bf16.mxu0 %v2242_v32 }
 0x289   : > { %1645 = vmatprep.mubr.f32.mxu1 %v3377_v46 }
 0x28b   : > { %2245 = vmatpush1.bf16.msra.mxu0 %v2244_v36 }
 0x28c   : > { %1646 = vmatmul.mubr.f32.gmra.mrb[24].mxu1 %v3401_v63  ;;  %2247 = vmatprep.subr.bf16.mxu0 %v2246_v3 }
 0x28d   : > { %1650 = vmatprep.mubr.f32.mxu1 %v3413_v44 }
 0x28f   : > { %2249 = vmatpush1.bf16.msra.mxu0 %v2248_v50 }
 0x290   : > { %1651 = vmatmul.mubr.f32.gmra.mrb[26].mxu1 %v3437_v22  ;;  %2251 = vmatprep.subr.bf16.mxu0 %v2250_v43 }
 0x291   : > { %1655 = vmatprep.mubr.f32.mxu1 %v3449_v28 }
 0x293   : > { %2253 = vmatpush1.bf16.msra.mxu0 %v2252_v56 }
 0x294   : > { %1656 = vmatmul.mubr.f32.gmra.mrb[28].mxu1 %v3472_v41 }
 0x295   : > { %1660 = vmatprep.mubr.f32.mxu1 %v3483_v49 }
 0x296   : > { %1513 = vmatmul.mubr.f32.vlgmr.msra.gmra.mrb[16].mxu0 %v3246_v21  ;;  %v3625_v21 = vld [vmem:[%s3763_s8] sm:$0x7f] }
 0x297   : > { %1518 = vmatprep.mubr.f32.mxu0 %v3269_v34  ;;  %v1197_v34 = vsub.s32 2, %v3148_v29 }
 0x298   : > { %1661 = vmatmul.mubr.f32.gmra.mrb[30].mxu1 %v3499_v59 }
 0x29a   : > { %1519 = vmatmul.mubr.f32.gmra.mrb[18].mxu0 %v3294_v53  ;;  %v1201_v53 = vsub.s32 3, %v3148_v29 }
 0x29b   : > { %1524 = vmatprep.mubr.f32.mxu0 %v3306_v62  ;;  %v3631_v62 = vrot.slane %v3625_v21, %v3174_v40 }
 0x29e   : > { %1525 = vmatmul.mubr.f32.gmra.mrb[20].mxu0 %v3329_v12  ;;  %v3635_v12 = vrot.slane %v3625_v21, %v3171_v37 }
 0x29f   : > { %1530 = vmatprep.mubr.f32.mxu0 %v3341_v19  ;;  %v3638_v19 = vrot.slane %v3625_v21, %v1197_v34 }
 0x2a2   : > { %1531 = vmatmul.mubr.f32.gmra.mrb[22].mxu0 %v3365_v11 }
 0x2a3   : > { %1536 = vmatprep.mubr.f32.mxu0 %v3377_v46  ;;  %v3641_v46 = vrot.slane %v3625_v21, %v1201_v53 }
 0x2a6   : > { %1537 = vmatmul.mubr.f32.gmra.mrb[24].mxu0 %v3401_v63 }
 0x2a7   : > { %1542 = vmatprep.mubr.f32.mxu0 %v3413_v44 }
 0x2aa   : > { %1543 = vmatmul.mubr.f32.gmra.mrb[26].mxu0 %v3437_v22 }
 0x2ab   : > { %1548 = vmatprep.mubr.f32.mxu0 %v3449_v28 }
 0x2ae   : > { %1549 = vmatmul.mubr.f32.gmra.mrb[28].mxu0 %v3472_v41 }
 0x2af   : > { %1554 = vmatprep.mubr.f32.mxu0 %v3483_v49 }
 0x2b2   : > { %1555 = vmatmul.mubr.f32.gmra.mrb[30].mxu0 %v3499_v59 }
 0x329   : > { %v1288_v11 = vpop.f32.mrb[0].mxu0 }
 0x32a   : > { %v1289_v63 = vadd.f32 %v1288_v11, %v3631_v62  ;;  %v1290_v44 = vpop.f32.mrb[1].mxu0 }
 0x32b   : > { %v1291_v22 = vadd.f32 %v1290_v44, %v3635_v12 }
 0x32c   : > { %2328 = vtanh.f32 %v1289_v63 }
 0x32d   : > { %2330 = vtanh.f32 %v1291_v22  ;;  %v1294_v59 = vpop.f32.mrb[2].mxu0 }
 0x32e   : > { %v1295_v61 = vadd.f32 %v1294_v59, %v3631_v62  ;;  %v1296_v0 = vpop.f32.mrb[3].mxu0 }
 0x32f   : > { %v1401_v28 = vpop.f32.mrb[0].mxu1  ;;  %v1297_v1 = vadd.f32 %v1296_v0, %v3635_v12 }
 0x330   : > { %v1402_v40 = vadd.f32 %v1401_v28, %v3638_v19  ;;  %v1403_v41 = vpop.f32.mrb[1].mxu1 }
 0x331   : > { %v1404_v37 = vadd.f32 %v1403_v41, %v3641_v46  ;;  %v1300_v6 = vpop.f32.mrb[4].mxu0 }
 0x332   : > { %2332 = vtanh.f32 %v1402_v40  ;;  %v1301_v8 = vadd.f32 %v1300_v6, %v3631_v62  ;;  %v1302_v9 = vpop.f32.mrb[5].mxu0 }
 0x333   : > { %2334 = vtanh.f32 %v1404_v37  ;;  %v1407_v49 = vpop.f32.mrb[2].mxu1  ;;  %v1303_v13 = vadd.f32 %v1302_v9, %v3635_v12 }
 0x334   : > { %v1408_v57 = vadd.f32 %v1407_v49, %v3638_v19  ;;  %v1409_v58 = vpop.f32.mrb[3].mxu1 }
 0x335   : > { %v1410_v60 = vadd.f32 %v1409_v58, %v3641_v46  ;;  %v1306_v18 = vpop.f32.mrb[6].mxu0 }
 0x336   : > { %2336 = vtanh.f32 %v1408_v57  ;;  %v2329_v10 = vpop.eup %2328  ;;  %v1307_v24 = vadd.f32 %v1306_v18, %v3631_v62  ;;  %v1308_v25 = vpop.f32.mrb[7].mxu0 }
 0x337   : > { %2338 = vtanh.f32 %v1410_v60  ;;  %v1413_v2 = vpop.f32.mrb[4].mxu1  ;;  %v2331_v14 = vpop.eup %2330  ;;  %1722 = vst [vmem:[#allocation7] sm:$0xff] %v2329_v10  ;;  %v1309_v26 = vadd.f32 %v1308_v25, %v3635_v12 }
 0x338   : > { %2340 = vtanh.f32 %v1295_v61  ;;  %v1414_v4 = vadd.f32 %v1413_v2, %v3638_v19  ;;  %v1415_v5 = vpop.f32.mrb[5].mxu1  ;;  %1723 = vst [vmem:[#allocation7 + $0x8] sm:$0xff] %v2331_v14 }
 0x339   : > { %2342 = vtanh.f32 %v1297_v1  ;;  %v1416_v7 = vadd.f32 %v1415_v5, %v3641_v46  ;;  %v1312_v32 = vpop.f32.mrb[8].mxu0  ;;  %v1213_v1 = vsub.s32 6, %v3148_v29 }
 0x33a   : > { %2344 = vtanh.f32 %v1414_v4  ;;  %v1313_v35 = vadd.f32 %v1312_v32, %v3631_v62  ;;  %v1314_v38 = vpop.f32.mrb[9].mxu0 }
 0x33b   : > { %2346 = vtanh.f32 %v1416_v7  ;;  %v1419_v20 = vpop.f32.mrb[6].mxu1  ;;  %v1315_v3 = vadd.f32 %v1314_v38, %v3635_v12 }
 0x33c   : > { %v2333_v15 = vpop.eup %2332  ;;  %2348 = vtanh.f32 %v1301_v8  ;;  %v1420_v16 = vadd.f32 %v1419_v20, %v3638_v19  ;;  %v1421_v17 = vpop.f32.mrb[7].mxu1 }
 0x33d   : > { %v2335_v54 = vpop.eup %2334  ;;  %1724 = vst [vmem:[#allocation7 + $0x10] sm:$0xff] %v2333_v15  ;;  %2350 = vtanh.f32 %v1303_v13  ;;  %v1422_v23 = vadd.f32 %v1421_v17, %v3641_v46  ;;  %v1318_v43 = vpop.f32.mrb[10].mxu0 }
 0x33e   : > { %1725 = vst [vmem:[#allocation7 + $0x18] sm:$0xff] %v2335_v54  ;;  %2352 = vtanh.f32 %v1420_v16  ;;  %v1319_v56 = vadd.f32 %v1318_v43, %v3631_v62  ;;  %v1320_v34 = vpop.f32.mrb[11].mxu0 }
 0x33f   : > { %2354 = vtanh.f32 %v1422_v23  ;;  %v1425_v27 = vpop.f32.mrb[8].mxu1  ;;  %v1321_v11 = vadd.f32 %v1320_v34, %v3635_v12 }
 0x340   : > { %v2337_v30 = vpop.eup %2336  ;;  %2356 = vtanh.f32 %v1307_v24  ;;  %v1426_v55 = vadd.f32 %v1425_v27, %v3638_v19  ;;  %v1427_v31 = vpop.f32.mrb[9].mxu1 }
 0x341   : > { %v2339_v39 = vpop.eup %2338  ;;  %1732 = vst [vmem:[#allocation7 + $0x48] sm:$0xff] %v2337_v30  ;;  %2358 = vtanh.f32 %v1309_v26  ;;  %v1428_v33 = vadd.f32 %v1427_v31, %v3641_v46  ;;  %v1324_v41 = vpop.f32.mrb[12].mxu0 }
 0x342   : > { %v2341_v36 = vpop.eup %2340  ;;  %1733 = vst [vmem:[#allocation7 + $0x50] sm:$0xff] %v2339_v39  ;;  %2360 = vtanh.f32 %v1426_v55  ;;  %v1325_v57 = vadd.f32 %v1324_v41, %v3631_v62  ;;  %v1326_v58 = vpop.f32.mrb[13].mxu0 }
 0x343   : > { %v2343_v42 = vpop.eup %2342  ;;  %1730 = vst [vmem:[#allocation7 + $0x38] sm:$0xff] %v2341_v36  ;;  %2362 = vtanh.f32 %v1428_v33  ;;  %v1431_v45 = vpop.f32.mrb[10].mxu1  ;;  %v1327_v60 = vadd.f32 %v1326_v58, %v3635_v12 }
 0x344   : > { %v2345_v47 = vpop.eup %2344  ;;  %1731 = vst [vmem:[#allocation7 + $0x40] sm:$0xff] %v2343_v42  ;;  %2364 = vtanh.f32 %v1313_v35  ;;  %v1432_v48 = vadd.f32 %v1431_v45, %v3638_v19  ;;  %v1433_v50 = vpop.f32.mrb[11].mxu1 }
 0x345   : > { %v2347_v51 = vpop.eup %2346  ;;  %1739 = vst [vmem:[#allocation7 + $0x80] sm:$0xff] %v2345_v47  ;;  %2366 = vtanh.f32 %v1315_v3  ;;  %v1434_v52 = vadd.f32 %v1433_v50, %v3641_v46  ;;  %v1330_v6 = vpop.f32.mrb[14].mxu0 }
 0x346   : > { %v2349_v53 = vpop.eup %2348  ;;  %1740 = vst [vmem:[#allocation7 + $0x88] sm:$0xff] %v2347_v51  ;;  %2368 = vtanh.f32 %v1432_v48  ;;  %v1331_v9 = vadd.f32 %v1330_v6, %v3631_v62  ;;  %v1332_v10 = vpop.f32.mrb[15].mxu0 }
 0x347   : > { %v2351_v63 = vpop.eup %2350  ;;  %1737 = vst [vmem:[#allocation7 + $0x70] sm:$0xff] %v2349_v53  ;;  %2370 = vtanh.f32 %v1434_v52  ;;  %v1437_v44 = vpop.f32.mrb[12].mxu1  ;;  %v1333_v14 = vadd.f32 %v1332_v10, %v3635_v12 }
 0x348   : > { %v2353_v22 = vpop.eup %2352  ;;  %1738 = vst [vmem:[#allocation7 + $0x78] sm:$0xff] %v2351_v63  ;;  %2372 = vtanh.f32 %v1319_v56  ;;  %v1438_v28 = vadd.f32 %v1437_v44, %v3638_v19  ;;  %v1439_v40 = vpop.f32.mrb[13].mxu1 }
 0x349   : > { %v2355_v37 = vpop.eup %2354  ;;  %1746 = vst [vmem:[#allocation7 + $0xb8] sm:$0xff] %v2353_v22  ;;  %2374 = vtanh.f32 %v1321_v11  ;;  %v1440_v49 = vadd.f32 %v1439_v40, %v3641_v46  ;;  %v1205_v22 = vsub.s32 4, %v3148_v29  ;;  %v1209_v40 = vsub.s32 5, %v3148_v29 }
 0x34a   : > { %v2357_v59 = vpop.eup %2356  ;;  %1747 = vst [vmem:[#allocation7 + $0xc0] sm:$0xff] %v2355_v37  ;;  %2376 = vtanh.f32 %v1438_v28 }
 0x34b   : > { %v2359_v61 = vpop.eup %2358  ;;  %1744 = vst [vmem:[#allocation7 + $0xa8] sm:$0xff] %v2357_v59  ;;  %2378 = vtanh.f32 %v1440_v49  ;;  %v1443_v0 = vpop.f32.mrb[14].mxu1  ;;  %v3691_v58 = vrot.slane %v3625_v21, %v1205_v22 }
 0x34c   : > { %v2361_v2 = vpop.eup %2360  ;;  %1745 = vst [vmem:[#allocation7 + $0xb0] sm:$0xff] %v2359_v61  ;;  %2380 = vtanh.f32 %v1325_v57  ;;  %v1444_v4 = vadd.f32 %v1443_v0, %v3638_v19  ;;  %v1445_v5 = vpop.f32.mrb[15].mxu1  ;;  %v3677_v19 = vrot.slane %v3625_v21, %v1213_v1 }
 0x34d   : > { %v2363_v7 = vpop.eup %2362  ;;  %1753 = vst [vmem:[#allocation7 + $0xf0] sm:$0xff] %v2361_v2  ;;  %2382 = vtanh.f32 %v1327_v60  ;;  %v1446_v8 = vadd.f32 %v1445_v5, %v3641_v46  ;;  %v3694_v60 = vrot.slane %v3625_v21, %v1209_v40 }
 0x34e   : > { %v2365_v13 = vpop.eup %2364  ;;  %1754 = vst [vmem:[#allocation7 + $0xf8] sm:$0xff] %v2363_v7  ;;  %2384 = vtanh.f32 %v1444_v4 }
 0x34f   : > { %v2367_v20 = vpop.eup %2366  ;;  %1751 = vst [vmem:[#allocation7 + $0xe0] sm:$0xff] %v2365_v13  ;;  %2386 = vtanh.f32 %v1446_v8  ;;  %v1944_v15 = vpop.f32.mrb[16].mxu1 }
 0x350   : > { %v2369_v16 = vpop.eup %2368  ;;  %1752 = vst [vmem:[#allocation7 + $0xe8] sm:$0xff] %v2367_v20  ;;  %2388 = vtanh.f32 %v1331_v9  ;;  %v1945_v17 = vpop.f32.mrb[17].mxu1 }
 0x351   : > { %v2371_v46 = vpop.eup %2370  ;;  %1760 = vst [vmem:[#allocation7 + $0x128] sm:$0xff] %v2369_v16  ;;  %2390 = vtanh.f32 %v1333_v14  ;;  %v1946_v62 = vadd.f32 %v1945_v17, %v1944_v15 }
 0x352   : > { %v2373_v18 = vpop.eup %2372  ;;  %1761 = vst [vmem:[#allocation7 + $0x130] sm:$0xff] %v2371_v46 }
 0x353   : > { %v2375_v54 = vpop.eup %2374  ;;  %1758 = vst [vmem:[#allocation7 + $0x118] sm:$0xff] %v2373_v18  ;;  %v1628_v12 = vadd.f32 %v1946_v62, %v3677_v19  ;;  %v1947_v23 = vpop.f32.mrb[18].mxu1 }
 0x354   : > { %v2377_v24 = vpop.eup %2376  ;;  %1759 = vst [vmem:[#allocation7 + $0x120] sm:$0xff] %v2375_v54  ;;  %v1948_v25 = vpop.f32.mrb[19].mxu1 }
 0x355   : > { %v2379_v26 = vpop.eup %2378  ;;  %1767 = vst [vmem:[#allocation7 + $0x160] sm:$0xff] %v2377_v24  ;;  %2392 = vtanh.f32 %v1628_v12  ;;  %v1949_v27 = vadd.f32 %v1948_v25, %v1947_v23 }
 0x356   : > { %v2381_v30 = vpop.eup %2380  ;;  %1768 = vst [vmem:[#allocation7 + $0x168] sm:$0xff] %v2379_v26 }
 0x357   : > { %v2383_v55 = vpop.eup %2382  ;;  %1765 = vst [vmem:[#allocation7 + $0x150] sm:$0xff] %v2381_v30  ;;  %v1633_v31 = vadd.f32 %v1949_v27, %v3677_v19  ;;  %v1950_v32 = vpop.f32.mrb[20].mxu1 }
 0x358   : > { %v2385_v39 = vpop.eup %2384  ;;  %1766 = vst [vmem:[#allocation7 + $0x158] sm:$0xff] %v2383_v55  ;;  %v1951_v33 = vpop.f32.mrb[21].mxu1 }
 0x359   : > { %v2387_v35 = vpop.eup %2386  ;;  %1774 = vst [vmem:[#allocation7 + $0x198] sm:$0xff] %v2385_v39  ;;  %2394 = vtanh.f32 %v1633_v31  ;;  %v1952_v38 = vadd.f32 %v1951_v33, %v1950_v32 }
 0x35a   : > { %v2389_v36 = vpop.eup %2388  ;;  %1775 = vst [vmem:[#allocation7 + $0x1a0] sm:$0xff] %v2387_v35 }
 0x35b   : > { %v2391_v3 = vpop.eup %2390  ;;  %1772 = vst [vmem:[#allocation7 + $0x188] sm:$0xff] %v2389_v36  ;;  %v1638_v42 = vadd.f32 %v1952_v38, %v3677_v19  ;;  %v1953_v45 = vpop.f32.mrb[22].mxu1 }
 0x35c   : > { %1773 = vst [vmem:[#allocation7 + $0x190] sm:$0xff] %v2391_v3  ;;  %v1954_v47 = vpop.f32.mrb[23].mxu1 }
 0x35d   : > { %2396 = vtanh.f32 %v1638_v42  ;;  %v1955_v48 = vadd.f32 %v1954_v47, %v1953_v45 }
 0x35f   : > { %v2393_v50 = vpop.eup %2392  ;;  %v1643_v43 = vadd.f32 %v1955_v48, %v3677_v19  ;;  %v1956_v51 = vpop.f32.mrb[24].mxu1 }
 0x360   : > { %1729 = vst.msk [vmem:[#allocation7 + $0x30] sm:$0xff] %vm1728_vm4, %v2393_v50  ;;  %v1957_v52 = vpop.f32.mrb[25].mxu1 }
 0x361   : > { %2398 = vtanh.f32 %v1643_v43  ;;  %v1958_v56 = vadd.f32 %v1957_v52, %v1956_v51 }
 0x363   : > { %v2395_v34 = vpop.eup %2394  ;;  %v1648_v53 = vadd.f32 %v1958_v56, %v3677_v19  ;;  %v1959_v11 = vpop.f32.mrb[26].mxu1 }
 0x364   : > { %1736 = vst.msk [vmem:[#allocation7 + $0x68] sm:$0xff] %vm1728_vm4, %v2395_v34  ;;  %v1960_v63 = vpop.f32.mrb[27].mxu1 }
 0x365   : > { %2400 = vtanh.f32 %v1648_v53  ;;  %v1961_v44 = vadd.f32 %v1960_v63, %v1959_v11 }
 0x367   : > { %v2397_v28 = vpop.eup %2396  ;;  %v1653_v41 = vadd.f32 %v1961_v44, %v3677_v19  ;;  %v1962_v37 = vpop.f32.mrb[28].mxu1 }
 0x368   : > { %1743 = vst.msk [vmem:[#allocation7 + $0xa0] sm:$0xff] %vm1728_vm4, %v2397_v28  ;;  %v1963_v49 = vpop.f32.mrb[29].mxu1 }
 0x369   : > { %2402 = vtanh.f32 %v1653_v41  ;;  %v1964_v57 = vadd.f32 %v1963_v49, %v1962_v37  ;;  %v1514_v1 = vpop.f32.mrb[16].mxu0 }
 0x36a   : > { %v1515_v4 = vadd.f32 %v1514_v1, %v3691_v58  ;;  %v1516_v5 = vpop.f32.mrb[17].mxu0 }
 0x36b   : > { %v2399_v59 = vpop.eup %2398  ;;  %v1658_v61 = vadd.f32 %v1964_v57, %v3677_v19  ;;  %v1965_v0 = vpop.f32.mrb[30].mxu1  ;;  %v1517_v7 = vadd.f32 %v1516_v5, %v3694_v60 }
 0x36c   : > { %1750 = vst.msk [vmem:[#allocation7 + $0xd8] sm:$0xff] %vm1728_vm4, %v2399_v59  ;;  %v1966_v29 = vpop.f32.mrb[31].mxu1 }
 0x36d   : > { %2404 = vtanh.f32 %v1658_v61  ;;  %v1967_v2 = vadd.f32 %v1966_v29, %v1965_v0  ;;  %v1520_v21 = vpop.f32.mrb[18].mxu0 }
 0x36e   : > { %2406 = vtanh.f32 %v1515_v4  ;;  %v1521_v9 = vadd.f32 %v1520_v21, %v3691_v58  ;;  %v1522_v10 = vpop.f32.mrb[19].mxu0 }
 0x36f   : > { %v2401_v6 = vpop.eup %2400  ;;  %v1663_v8 = vadd.f32 %v1967_v2, %v3677_v19  ;;  %2408 = vtanh.f32 %v1517_v7  ;;  %v1523_v14 = vadd.f32 %v1522_v10, %v3694_v60 }
 0x370   : > { %1757 = vst.msk [vmem:[#allocation7 + $0x110] sm:$0xff] %vm1728_vm4, %v2401_v6 }
 0x371   : > { %2410 = vtanh.f32 %v1663_v8  ;;  %v1526_v20 = vpop.f32.mrb[20].mxu0 }
 0x372   : > { %2412 = vtanh.f32 %v1521_v9  ;;  %v1527_v15 = vadd.f32 %v1526_v20, %v3691_v58  ;;  %v1528_v19 = vpop.f32.mrb[21].mxu0 }
 0x373   : > { %v2403_v13 = vpop.eup %2402  ;;  %2414 = vtanh.f32 %v1523_v14  ;;  %v1529_v17 = vadd.f32 %v1528_v19, %v3694_v60 }
 0x374   : > { %1764 = vst.msk [vmem:[#allocation7 + $0x148] sm:$0xff] %vm1728_vm4, %v2403_v13  ;;  %2416 = vtanh.f32 %v1527_v15 }
 0x375   : > { %2418 = vtanh.f32 %v1529_v17  ;;  %v1532_v46 = vpop.f32.mrb[22].mxu0 }
 0x376   : > { %v1533_v18 = vadd.f32 %v1532_v46, %v3691_v58  ;;  %v1534_v54 = vpop.f32.mrb[23].mxu0 }
 0x377   : > { %v2405_v16 = vpop.eup %2404  ;;  %v1535_v23 = vadd.f32 %v1534_v54, %v3694_v60 }
 0x378   : > { %1771 = vst.msk [vmem:[#allocation7 + $0x180] sm:$0xff] %vm1728_vm4, %v2405_v16  ;;  %v2407_v62 = vpop.eup %2406  ;;  %2420 = vtanh.f32 %v1533_v18 }
 0x379   : > { %v2409_v12 = vpop.eup %2408  ;;  %1726 = vst [vmem:[#allocation7 + $0x20] sm:$0xff] %v2407_v62  ;;  %2422 = vtanh.f32 %v1535_v23  ;;  %v1538_v25 = vpop.f32.mrb[24].mxu0 }
 0x37a   : > { %1727 = vst [vmem:[#allocation7 + $0x28] sm:$0xff] %v2409_v12  ;;  %v1539_v27 = vadd.f32 %v1538_v25, %v3691_v58  ;;  %v1540_v30 = vpop.f32.mrb[25].mxu0 }
 0x37b   : > { %v2411_v24 = vpop.eup %2410  ;;  %v1541_v31 = vadd.f32 %v1540_v30, %v3694_v60 }
 0x37c   : > { %1778 = vst.msk [vmem:[#allocation7 + $0x1b8] sm:$0xff] %vm1728_vm4, %v2411_v24  ;;  %v2413_v26 = vpop.eup %2412  ;;  %2424 = vtanh.f32 %v1539_v27 }
 0x37d   : > { %v2415_v55 = vpop.eup %2414  ;;  %1734 = vst [vmem:[#allocation7 + $0x58] sm:$0xff] %v2413_v26  ;;  %2426 = vtanh.f32 %v1541_v31  ;;  %v1544_v32 = vpop.f32.mrb[26].mxu0 }
 0x37e   : > { %1735 = vst [vmem:[#allocation7 + $0x60] sm:$0xff] %v2415_v55  ;;  %v2417_v39 = vpop.eup %2416  ;;  %v1545_v33 = vadd.f32 %v1544_v32, %v3691_v58  ;;  %v1546_v35 = vpop.f32.mrb[27].mxu0 }
 0x37f   : > { %v2419_v38 = vpop.eup %2418  ;;  %1741 = vst [vmem:[#allocation7 + $0x90] sm:$0xff] %v2417_v39  ;;  %v1547_v36 = vadd.f32 %v1546_v35, %v3694_v60 }
 0x380   : > { %1742 = vst [vmem:[#allocation7 + $0x98] sm:$0xff] %v2419_v38  ;;  %2428 = vtanh.f32 %v1545_v33 }
 0x381   : > { %2430 = vtanh.f32 %v1547_v36  ;;  %v1550_v3 = vpop.f32.mrb[28].mxu0 }
 0x382   : > { %v2421_v42 = vpop.eup %2420  ;;  %v1551_v45 = vadd.f32 %v1550_v3, %v3691_v58  ;;  %v1552_v47 = vpop.f32.mrb[29].mxu0 }
 0x383   : > { %v2423_v48 = vpop.eup %2422  ;;  %1748 = vst [vmem:[#allocation7 + $0xc8] sm:$0xff] %v2421_v42  ;;  %v1553_v50 = vadd.f32 %v1552_v47, %v3694_v60 }
 0x384   : > { %1749 = vst [vmem:[#allocation7 + $0xd0] sm:$0xff] %v2423_v48  ;;  %2432 = vtanh.f32 %v1551_v45 }
 0x385   : > { %2434 = vtanh.f32 %v1553_v50  ;;  %v1556_v43 = vpop.f32.mrb[30].mxu0 }
 0x386   : > { %v2425_v51 = vpop.eup %2424  ;;  %v1557_v52 = vadd.f32 %v1556_v43, %v3691_v58  ;;  %v1558_v56 = vpop.f32.mrb[31].mxu0 }
 0x387   : > { %v2427_v34 = vpop.eup %2426  ;;  %1755 = vst [vmem:[#allocation7 + $0x100] sm:$0xff] %v2425_v51  ;;  %v1559_v53 = vadd.f32 %v1558_v56, %v3694_v60 }
 0x388   : > { %1756 = vst [vmem:[#allocation7 + $0x108] sm:$0xff] %v2427_v34  ;;  %2436 = vtanh.f32 %v1557_v52 }
 0x389   : > { %2438 = vtanh.f32 %v1559_v53 }
 0x38a   : > { %v2429_v11 = vpop.eup %2428 }
 0x38b   : > { %v2431_v63 = vpop.eup %2430  ;;  %1762 = vst [vmem:[#allocation7 + $0x138] sm:$0xff] %v2429_v11 }
 0x38c   : > { %1763 = vst [vmem:[#allocation7 + $0x140] sm:$0xff] %v2431_v63 }
 0x38e   : > { %v2433_v44 = vpop.eup %2432 }
 0x38f   : > { %v2435_v22 = vpop.eup %2434  ;;  %1769 = vst [vmem:[#allocation7 + $0x170] sm:$0xff] %v2433_v44 }
 0x390   : > { %1770 = vst [vmem:[#allocation7 + $0x178] sm:$0xff] %v2435_v22 }
 0x392   : > { %v2437_v28 = vpop.eup %2436 }
 0x393   : > { %v2439_v40 = vpop.eup %2438  ;;  %1776 = vst [vmem:[#allocation7 + $0x1a8] sm:$0xff] %v2437_v28 }
 0x394   : > { %1777 = vst [vmem:[#allocation7 + $0x1b0] sm:$0xff] %v2439_v40 }
 0x395 PF: > { %p3721_p6 = scmp.eq.s32.totalorder %s1869_s12, 1  ;;  %s2496_s27 = smov [#allocation7]  }
 0x396   : > { %s1795_s28 = sshll.u32 %s2496_s27, 4  ;;  %s1796_s28 = int_to_ptr.vmem [resolvable:$true] %s1795_s28 }
 0x397   : > { %s2440_s30 = scalar_lea.vmem %s1796_s28, 7168  ;;  %s2446_s29 = scalar_lea.vmem %s1796_s28, 14336 }
 0x398   : > { %p2441_p7 = scmp.ne.s32.totalorder %s1796_s28, %s2440_s30  ;;  %p2447_p10 = scmp.lt.s32.totalorder %s1796_s28, %s1796_s28 }
 0x399   : > { %p2448_p11 = scmp.lt.s32.totalorder %s2446_s29, %s2440_s30 }
 0x39a   : > { %p2442_p8 = pnand %p2441_p7, %p3721_p6 }
 0x39b   : > { %p2449_p12 = por %p2448_p11, %p2447_p10 }
 0x39c   : > { %p2443_p9 = pneg %p2442_p8 }
 0x39e   : > { %p2450_p13 = pnand %p2449_p12, %p2443_p9 }
 0x3a0   : > { %2453 = shalt.err (!%p2450_p13)
}
 0x3a1   : > { %s2454_s16 = scalar_lea.hbm %s3764_s9, 7168 }
 0x3a2   : > { %p2455_p0 = scmp.ne.s32.totalorder %s3764_s9, %s2454_s16  ;;  %p2460_p3 = scmp.lt.u32.totalorder %s2454_s16, %s3764_s9 }
 0x3a4   : > { %p2456_p1 = pnand %p2455_p0, %p3721_p6 }
 0x3a6   : > { %p2457_p2 = pneg %p2456_p1 }
 0x3a8   : > { %p2462_p4 = pnand %p2460_p3, %p2457_p2 }
 0x3aa   : > { %2465 = shalt.err (!%p2462_p4)
}
 0x3ab   : > { %s2497_s21 = smov 896   ;;  %s2498_s22 = smov 56  }
 0x3ac   : > { %2287 = dma.vmem_to_hbm [thread:$0]  (%p3721_p6), %s1796_s28, 7168, %s3764_s9, [#allocation8], %s2497_s21, %s2497_s21, %s2498_s22  }
 0x3ad PF: > { %p2295_p5 = scmp.ge.s32.totalorder %s2492_s11, 2  ;;  %p2296_p7 = scmp.eq.s32.totalorder %s1870_s13, 1 }
 0x3af   : > { %p2291_p8 = pnand %p2296_p7, %p2295_p5 }
 0x3b1   : > { %2479 = dma.done.wait (!%p2291_p8), [#allocation8], 7168  }
 0x3b2   : > { %2481 = vsyncadd (!%p2291_p8), [#allocation8], 4294960128  ;;  %s22_s11 = sadd.s32 1, %s2492_s11   ;;  %s3770_s30 = smov %s2488_s10 }
 0x3b3   : > { %p19_p9 = scmp.ge.s32.totalorder %s22_s11, 4   ;;  %s3771_s10 = smov %s3773_s14 }
 0x3b5   :  { %21 = sbr.rel (!%p19_p9) target bundleno = 3 (0x3), region = 109 }
 0x3bc   :  { %1816 = vsyncpa [#allocation8], 1 }
 0x3bd   :  { %1818 = vsyncpa [#allocation8 + $0x1], 1 }

</bundles_post_ra>
